<compile_context>
chip_gen: v7x
topology: tpu7x:2x2x1
jax: 0.10.0
libtpu: 0.0.40
codegen_flags: <defaults>
</compile_context>

<pallas_src>
import functools
import math

import jax
import jax.numpy as jnp
from jax.experimental import pallas as pl
from jax.experimental.pallas import tpu as pltpu


# ----------------------------------------------------------------------------
# Pallas kernel
# ----------------------------------------------------------------------------
def aggregator_kernel(hidden_ref, items1_ref, mask1_ref, items2_ref, mask2_ref,
                      wa_ref, wbe1_ref, wbe2_ref, rep1_ref, rep2_ref,
                      sum1_ref, sum2_ref, wc_ref,
                      hf1_ref, hf2_ref, hf_ref, acc_ref, *, alpha, kinds):
    f32 = jnp.float32
    h = hidden_ref[...]                              # (tm, D) f32
    tm, D = h.shape
    NEG = jnp.float32(-1e30)

    wa_all = wa_ref[...]                             # (K, D)
    rep1 = rep1_ref[...]                             # (N1, N1*D) 0/1
    rep2 = rep2_ref[...]                             # (N2, N2*D) 0/1
    sum1 = sum1_ref[...]                             # (N1*D, D)  0/1
    sum2 = sum2_ref[...]                             # (N2*D, D)  0/1

    def leaky(x):
        return jnp.where(x > 0, x, alpha * x)

    def eff_mask(m):
        # PyTorch: rows whose mask sums to 0 are rewritten (in place) to all-True.
        empty = jnp.sum(m, axis=-1, keepdims=True) == 0.0
        return jnp.where(empty, jnp.ones_like(m), m)

    for k in range(kinds):                           # kinds is a static Python int
        wa = wa_all[k]                               # (D,)
        # hidden-side score, once per kind (shared by both segments)
        e_h = jnp.sum(h * wa[None, :], axis=-1, keepdims=True)        # (tm, 1)

        it1 = items1_ref[k].astype(f32)              # (tm, N1*D) lane-dense
        it2 = items2_ref[k].astype(f32)              # (tm, N2*D)

        # neighbour-side scores as one MXU matmul per segment (block-diag wb)
        e1 = leaky(e_h + jnp.dot(it1, wbe1_ref[k], preferred_element_type=f32))  # (tm, N1)
        e2 = leaky(e_h + jnp.dot(it2, wbe2_ref[k], preferred_element_type=f32))  # (tm, N2)

        eff1 = eff_mask(mask1_ref[k])                # (tm, N1)
        eff2 = eff_mask(mask2_ref[k])
        a1 = jnp.where(eff1 > 0.0, e1, NEG)
        a2 = jnp.where(eff2 > 0.0, e2, NEG)

        # Shared softmax pieces: one exp + one weighted-sum pass feeds both the
        # per-segment softmaxes and the joint (concatenated) softmax exactly.
        mx = jnp.maximum(jnp.max(a1, axis=-1, keepdims=True),
                         jnp.max(a2, axis=-1, keepdims=True))          # (tm, 1)
        p1 = jnp.exp(a1 - mx)
        p2 = jnp.exp(a2 - mx)
        s1 = jnp.sum(p1, axis=-1, keepdims=True)
        s2 = jnp.sum(p2, axis=-1, keepdims=True)

        # neighbour-weighted sums: replicate p across lanes (MXU), lane-dense
        # elementwise multiply (VPU), group-reduce back to (tm, D) (MXU).
        u1 = jnp.dot(jnp.dot(p1, rep1, preferred_element_type=f32) * it1, sum1,
                     preferred_element_type=f32)                        # (tm, D)
        u2 = jnp.dot(jnp.dot(p2, rep2, preferred_element_type=f32) * it2, sum2,
                     preferred_element_type=f32)                        # (tm, D)

        r1 = u1 * pl.reciprocal(s1, approx=True)
        r2 = u2 * pl.reciprocal(s2, approx=True)
        rc = (u1 + u2) * pl.reciprocal(s1 + s2, approx=True)

        if kinds > 1:
            # Fused combine: one tall (3*tm, D) @ (D, D) dot per kind, accumulated
            # in VMEM scratch (== concat_k(r_k) @ Wc).
            stacked = jnp.concatenate([r1, r2, rc], axis=0)             # (3*tm, D)
            wck = wc_ref[k * D:(k + 1) * D, :]                          # (D, D)
            contrib = jnp.dot(stacked, wck, preferred_element_type=f32)
            if k == 0:
                acc_ref[...] = contrib
            else:
                acc_ref[...] += contrib
        else:
            hf1_ref[...] = r1.astype(hf1_ref.dtype)
            hf2_ref[...] = r2.astype(hf2_ref.dtype)
            hf_ref[...] = rc.astype(hf_ref.dtype)

    if kinds > 1:
        out = acc_ref[...]                                              # (3*tm, D)
        hf1_ref[...] = out[:tm].astype(hf1_ref.dtype)
        hf2_ref[...] = out[tm:2 * tm].astype(hf2_ref.dtype)
        hf_ref[...] = out[2 * tm:].astype(hf_ref.dtype)


# ----------------------------------------------------------------------------
# Wrapper
# ----------------------------------------------------------------------------
def _choose_tile_rows(M, D, K, N1, N2, *, vmem_budget_bytes=20 * 1024 * 1024):
    lanes = lambda n: ((n + 127) // 128) * 128
    per_row = (
        4 * lanes(D)                                  # hidden f32
        + 2 * K * (lanes(N1 * D) + lanes(N2 * D))     # items bf16
        + 4 * K * (lanes(N1) + lanes(N2))             # masks f32
        + 3 * 4 * lanes(D)                            # outputs f32
    ) * 2                                             # double buffering
    per_row += 3 * 4 * lanes(D)                       # combine scratch (1x)
    cap = min(256, max(16, vmem_budget_bytes // max(per_row, 1)))
    if M >= 8 * 16:
        # keep >= ~8 grid steps (v7x has 2 TensorCores sharing the parallel axis)
        cap = min(cap, max(16, (M // 8) // 16 * 16))
    tm = None
    t = 16                                            # 16-row multiples: safe for bf16 sublane packing
    while t <= min(cap, M):
        if M % t == 0:
            tm = t
        t += 16
    if tm is None:
        tm = M                                        # full-extent block is always legal
    return tm


def attribute_aggregator_forward(hidden, items1, mask1, items2, mask2, W, Wc,
                                 *, alpha=0.2, tm=None):
    """hidden (B,S,D); items* (K,B,S,N*,D); mask* (K,B,S,N*) float {0,1};
    W (K, 2*D); Wc (K*D, D) (combine weight pre-transposed: out = x @ Wc)."""
    B, S, D = hidden.shape
    K = W.shape[0]
    N1 = items1.shape[3]
    N2 = items2.shape[3]
    M = B * S
    ND1, ND2 = N1 * D, N2 * D
    assert M % 8 == 0, "B*S must be a multiple of 8"

    if tm is None:
        tm = _choose_tile_rows(M, D, K, N1, N2)
    assert M % tm == 0 and (tm % 8 == 0 or tm == M)

    f32 = jnp.float32
    h = hidden.reshape(M, D).astype(f32)
    it1 = items1.reshape(K, M, ND1).astype(jnp.bfloat16)   # bf16 DMA, f32 compute
    it2 = items2.reshape(K, M, ND2).astype(jnp.bfloat16)
    m1 = mask1.reshape(K, M, N1).astype(f32)
    m2 = mask2.reshape(K, M, N2).astype(f32)

    Wf = W.astype(f32)
    wa = Wf[:, :D]                                          # (K, D)
    wb = Wf[:, D:]                                          # (K, D)
    eye1 = jnp.eye(N1, dtype=f32)
    eye2 = jnp.eye(N2, dtype=f32)
    # wbe[k, n*D+d, n'] = wb[k, d] * (n == n')   (block-diagonal score weights)
    wbe1 = (wb[:, None, :, None] * eye1[None, :, None, :]).reshape(K, ND1, N1)
    wbe2 = (wb[:, None, :, None] * eye2[None, :, None, :]).reshape(K, ND2, N2)
    # rep[n, n'*D+d] = (n == n')   -- lane replication of softmax weights
    rep1 = jnp.repeat(eye1, D, axis=1)                      # (N1, ND1)
    rep2 = jnp.repeat(eye2, D, axis=1)                      # (N2, ND2)
    # sum[n*D+d, d'] = (d == d')   -- group-reduce over neighbours
    sum1 = jnp.tile(jnp.eye(D, dtype=f32), (N1, 1))         # (ND1, D)
    sum2 = jnp.tile(jnp.eye(D, dtype=f32), (N2, 1))         # (ND2, D)
    wc = Wc.astype(f32)                                     # (K*D, D)

    kernel = functools.partial(aggregator_kernel, alpha=alpha, kinds=K)
    grid = (M // tm,)

    hf1, hf2, hf = pl.pallas_call(
        kernel,
        out_shape=(jax.ShapeDtypeStruct((M, D), f32),) * 3,
        grid_spec=pltpu.PrefetchScalarGridSpec(
            num_scalar_prefetch=0,
            grid=grid,
            in_specs=[
                pl.BlockSpec((tm, D), lambda i: (i, 0)),             # hidden
                pl.BlockSpec((K, tm, ND1), lambda i: (0, i, 0)),     # items1 (bf16)
                pl.BlockSpec((K, tm, N1), lambda i: (0, i, 0)),      # mask1
                pl.BlockSpec((K, tm, ND2), lambda i: (0, i, 0)),     # items2 (bf16)
                pl.BlockSpec((K, tm, N2), lambda i: (0, i, 0)),      # mask2
                pl.BlockSpec((K, D), lambda i: (0, 0)),              # wa
                pl.BlockSpec((K, ND1, N1), lambda i: (0, 0, 0)),     # wbe1
                pl.BlockSpec((K, ND2, N2), lambda i: (0, 0, 0)),     # wbe2
                pl.BlockSpec((N1, ND1), lambda i: (0, 0)),           # rep1
                pl.BlockSpec((N2, ND2), lambda i: (0, 0)),           # rep2
                pl.BlockSpec((ND1, D), lambda i: (0, 0)),            # sum1
                pl.BlockSpec((ND2, D), lambda i: (0, 0)),            # sum2
                pl.BlockSpec((K * D, D), lambda i: (0, 0)),          # Wc
            ],
            out_specs=(
                pl.BlockSpec((tm, D), lambda i: (i, 0)),
                pl.BlockSpec((tm, D), lambda i: (i, 0)),
                pl.BlockSpec((tm, D), lambda i: (i, 0)),
            ),
            scratch_shapes=[pltpu.VMEM((3 * tm, D), jnp.float32)],   # combine accumulator
        ),
        compiler_params=pltpu.CompilerParams(
            dimension_semantics=("parallel",),
            vmem_limit_bytes=32 * 1024 * 1024,
        ),
    )(h, it1, m1, it2, m2, wa, wbe1, wbe2, rep1, rep2, sum1, sum2, wc)

    return (hf1.reshape(B, S, D), hf2.reshape(B, S, D), hf.reshape(B, S, D))


# ----------------------------------------------------------------------------
# Pure-JAX reference (mirrors the PyTorch forward, incl. in-place mask rewrite)
# ----------------------------------------------------------------------------
def reference_forward(hidden, items1, mask1, items2, mask2, W, Wc, alpha):
    K = W.shape[0]
    D = hidden.shape[-1]

    def get_weight(items):
        E = []
        for k in range(K):
            wa, wb = W[k, :D], W[k, D:]
            e = (jnp.einsum('bsd,d->bs', hidden, wa)[..., None]
                 + jnp.einsum('bsnd,d->bsn', items[k], wb))
            E.append(jnp.where(e > 0, e, alpha * e))
        return E

    def generate_mirror(E, items, masks):
        reps, effs = [], []
        for k in range(K):
            m = masks[k]
            empty = jnp.sum(m, axis=2, keepdims=True) == 0
            eff = jnp.where(empty, jnp.ones_like(m), m)
            a = jnp.where(eff > 0, E[k], -jnp.inf)
            a = jax.nn.softmax(a, axis=2)
            reps.append(jnp.sum(a[..., None] * items[k], axis=2))
            effs.append(eff)
        hf = jnp.concatenate(reps, axis=-1)
        if K > 1:
            hf = hf @ Wc
        return hf, effs

    E1, E2 = get_weight(items1), get_weight(items2)
    hf1, eff1 = generate_mirror(E1, items1, mask1)
    hf2, eff2 = generate_mirror(E2, items2, mask2)
    E = [jnp.concatenate([E1[k], E2[k]], axis=-1) for k in range(K)]
    items = [jnp.concatenate([items1[k], items2[k]], axis=2) for k in range(K)]
    masks = [jnp.concatenate([eff1[k], eff2[k]], axis=2) for k in range(K)]
    hf, _ = generate_mirror(E, items, masks)
    return hf1, hf2, hf


# ----------------------------------------------------------------------------
if __name__ == "__main__":
    B, S, D, K, N1, N2 = 2, 64, 32, 2, 4, 6
    alpha = 0.2

    key = jax.random.PRNGKey(0)
    ks = jax.random.split(key, 7)
    hidden = jax.random.normal(ks[0], (B, S, D), jnp.float32)
    items1 = jax.random.normal(ks[1], (K, B, S, N1, D), jnp.float32)
    items2 = jax.random.normal(ks[2], (K, B, S, N2, D), jnp.float32)
    mask1 = (jax.random.uniform(ks[3], (K, B, S, N1)) < 0.6).astype(jnp.float32)
    mask2 = (jax.random.uniform(ks[4], (K, B, S, N2)) < 0.6).astype(jnp.float32)
    # Force some all-empty neighbor rows to exercise the mask-rewrite path.
    mask1 = mask1.at[0, 0, 0, :].set(0.0)
    mask2 = mask2.at[1, 1, 3, :].set(0.0)

    # Deterministic parameter init (PyTorch Linear-style uniform bounds).
    bw = 1.0 / math.sqrt(2 * D)
    W = jax.random.uniform(ks[5], (K, 2 * D), jnp.float32, -bw, bw)
    bc = 1.0 / math.sqrt(K * D)
    Wc = jax.random.uniform(ks[6], (K * D, D), jnp.float32, -bc, bc)

    hf1, hf2, hf = attribute_aggregator_forward(
        hidden, items1, mask1, items2, mask2, W, Wc, alpha=alpha)
    jax.block_until_ready((hf1, hf2, hf))

    r1, r2, rc = reference_forward(hidden, items1, mask1, items2, mask2, W, Wc, alpha)
    assert jnp.allclose(hf1, r1, rtol=2e-2, atol=2e-2), "hf_1 mismatch"
    assert jnp.allclose(hf2, r2, rtol=2e-2, atol=2e-2), "hf_2 mismatch"
    assert jnp.allclose(hf, rc, rtol=2e-2, atol=2e-2), "hf mismatch"

    print("KERNEL_OK")
</pallas_src>

<mosaic_0001>
module attributes {stable_mosaic.version = 11 : i64} {
  func.func @aggregator_kernel(%arg0: i32, %arg1: memref<16x32xf32, #tpu.memory_space<vmem>>, %arg2: memref<2x16x128xbf16, #tpu.memory_space<vmem>>, %arg3: memref<2x16x4xf32, #tpu.memory_space<vmem>>, %arg4: memref<2x16x192xbf16, #tpu.memory_space<vmem>>, %arg5: memref<2x16x6xf32, #tpu.memory_space<vmem>>, %arg6: memref<2x32xf32, #tpu.memory_space<vmem>>, %arg7: memref<2x128x4xf32, #tpu.memory_space<vmem>>, %arg8: memref<2x192x6xf32, #tpu.memory_space<vmem>>, %arg9: memref<4x128xf32, #tpu.memory_space<vmem>>, %arg10: memref<6x192xf32, #tpu.memory_space<vmem>>, %arg11: memref<128x32xf32, #tpu.memory_space<vmem>>, %arg12: memref<192x32xf32, #tpu.memory_space<vmem>>, %arg13: memref<64x32xf32, #tpu.memory_space<vmem>>, %arg14: memref<16x32xf32, #tpu.memory_space<vmem>>, %arg15: memref<16x32xf32, #tpu.memory_space<vmem>>, %arg16: memref<16x32xf32, #tpu.memory_space<vmem>>, %arg17: memref<48x32xf32, #tpu.memory_space<vmem>>) attributes {dimension_semantics = [#tpu.dimension_semantics<parallel>], iteration_bounds = array<i64: 8>, scalar_prefetch = 0 : i64, scratch_operands = 1 : i64, tpu.core_type = #tpu.core_type<tc>, window_params = [{transform_indices = @transform_0, window_bounds = array<i64: 16, 32>}, {transform_indices = @transform_1, window_bounds = array<i64: 2, 16, 128>}, {transform_indices = @transform_2, window_bounds = array<i64: 2, 16, 4>}, {transform_indices = @transform_3, window_bounds = array<i64: 2, 16, 192>}, {transform_indices = @transform_4, window_bounds = array<i64: 2, 16, 6>}, {pipeline_mode = #tpu.pipeline_mode<synchronous>, transform_indices = @transform_5, window_bounds = array<i64: 2, 32>}, {pipeline_mode = #tpu.pipeline_mode<synchronous>, transform_indices = @transform_6, window_bounds = array<i64: 2, 128, 4>}, {pipeline_mode = #tpu.pipeline_mode<synchronous>, transform_indices = @transform_7, window_bounds = array<i64: 2, 192, 6>}, {pipeline_mode = #tpu.pipeline_mode<synchronous>, transform_indices = @transform_8, window_bounds = array<i64: 4, 128>}, {pipeline_mode = #tpu.pipeline_mode<synchronous>, transform_indices = @transform_9, window_bounds = array<i64: 6, 192>}, {pipeline_mode = #tpu.pipeline_mode<synchronous>, transform_indices = @transform_10, window_bounds = array<i64: 128, 32>}, {pipeline_mode = #tpu.pipeline_mode<synchronous>, transform_indices = @transform_11, window_bounds = array<i64: 192, 32>}, {pipeline_mode = #tpu.pipeline_mode<synchronous>, transform_indices = @transform_12, window_bounds = array<i64: 64, 32>}, {transform_indices = @transform_13, window_bounds = array<i64: 16, 32>}, {transform_indices = @transform_14, window_bounds = array<i64: 16, 32>}, {transform_indices = @transform_15, window_bounds = array<i64: 16, 32>}]} {
    %c0 = arith.constant 0 : index
    %c0_0 = arith.constant 0 : index
    %0 = vector.load %arg1[%c0, %c0_0] : memref<16x32xf32, #tpu.memory_space<vmem>>, vector<16x32xf32>
    %c0_1 = arith.constant 0 : index
    %c0_2 = arith.constant 0 : index
    %1 = vector.load %arg6[%c0_1, %c0_2] : memref<2x32xf32, #tpu.memory_space<vmem>>, vector<2x32xf32>
    %c0_3 = arith.constant 0 : index
    %c0_4 = arith.constant 0 : index
    %2 = vector.load %arg9[%c0_3, %c0_4] : memref<4x128xf32, #tpu.memory_space<vmem>>, vector<4x128xf32>
    %c0_5 = arith.constant 0 : index
    %c0_6 = arith.constant 0 : index
    %3 = vector.load %arg10[%c0_5, %c0_6] : memref<6x192xf32, #tpu.memory_space<vmem>>, vector<6x192xf32>
    %c0_7 = arith.constant 0 : index
    %c0_8 = arith.constant 0 : index
    %4 = vector.load %arg11[%c0_7, %c0_8] : memref<128x32xf32, #tpu.memory_space<vmem>>, vector<128x32xf32>
    %c0_9 = arith.constant 0 : index
    %c0_10 = arith.constant 0 : index
    %5 = vector.load %arg12[%c0_9, %c0_10] : memref<192x32xf32, #tpu.memory_space<vmem>>, vector<192x32xf32>
    %6 = vector.extract_strided_slice %1 {offsets = [0, 0], sizes = [1, 32], strides = [1, 1]} : vector<2x32xf32> to vector<1x32xf32>
    %7 = vector.shape_cast %6 : vector<1x32xf32> to vector<32xf32>
    %8 = vector.shape_cast %7 : vector<32xf32> to vector<1x32xf32>
    %9 = vector.broadcast %8 : vector<1x32xf32> to vector<16x32xf32>
    %10 = arith.mulf %0, %9 : vector<16x32xf32>
    %cst = arith.constant dense<0.000000e+00> : vector<16xf32>
    %11 = vector.multi_reduction <add>, %10, %cst [1] : vector<16x32xf32> to vector<16xf32>
    %12 = vector.shape_cast %11 : vector<16xf32> to vector<16x1xf32>
    %c0_11 = arith.constant 0 : index
    %c0_12 = arith.constant 0 : index
    %c0_13 = arith.constant 0 : index
    %13 = vector.load %arg2[%c0_11, %c0_12, %c0_13] : memref<2x16x128xbf16, #tpu.memory_space<vmem>>, vector<1x16x128xbf16>
    %14 = vector.shape_cast %13 : vector<1x16x128xbf16> to vector<16x128xbf16>
    %15 = arith.extf %14 : vector<16x128xbf16> to vector<16x128xf32>
    %c0_14 = arith.constant 0 : index
    %c0_15 = arith.constant 0 : index
    %c0_16 = arith.constant 0 : index
    %16 = vector.load %arg4[%c0_14, %c0_15, %c0_16] : memref<2x16x192xbf16, #tpu.memory_space<vmem>>, vector<1x16x192xbf16>
    %17 = vector.shape_cast %16 : vector<1x16x192xbf16> to vector<16x192xbf16>
    %18 = arith.extf %17 : vector<16x192xbf16> to vector<16x192xf32>
    %c0_17 = arith.constant 0 : index
    %c0_18 = arith.constant 0 : index
    %c0_19 = arith.constant 0 : index
    %19 = vector.load %arg7[%c0_17, %c0_18, %c0_19] : memref<2x128x4xf32, #tpu.memory_space<vmem>>, vector<1x128x4xf32>
    %20 = vector.shape_cast %19 : vector<1x128x4xf32> to vector<128x4xf32>
    %cst_20 = arith.constant dense<0.000000e+00> : vector<16x4xf32>
    %21 = tpu.matmul %15, %20, %cst_20 {dimension_numbers = #tpu.dot_dimension_numbers<[1], [0], [0], [1], [0, 0, 1, 1], [], []>} : vector<16x128xf32>, vector<128x4xf32>, vector<16x4xf32> -> vector<16x4xf32>
    %22 = vector.broadcast %12 : vector<16x1xf32> to vector<16x4xf32>
    %23 = arith.addf %22, %21 : vector<16x4xf32>
    %cst_21 = arith.constant 0.000000e+00 : f32
    %24 = vector.broadcast %cst_21 : f32 to vector<16x4xf32>
    %25 = arith.cmpf ogt, %23, %24 : vector<16x4xf32>
    %cst_22 = arith.constant 2.000000e-01 : f32
    %26 = vector.broadcast %cst_22 : f32 to vector<16x4xf32>
    %27 = arith.mulf %26, %23 : vector<16x4xf32>
    %28 = arith.select %25, %23, %27 : vector<16x4xi1>, vector<16x4xf32>
    %c0_23 = arith.constant 0 : index
    %c0_24 = arith.constant 0 : index
    %c0_25 = arith.constant 0 : index
    %29 = vector.load %arg8[%c0_23, %c0_24, %c0_25] : memref<2x192x6xf32, #tpu.memory_space<vmem>>, vector<1x192x6xf32>
    %30 = vector.shape_cast %29 : vector<1x192x6xf32> to vector<192x6xf32>
    %cst_26 = arith.constant dense<0.000000e+00> : vector<16x6xf32>
    %31 = tpu.matmul %18, %30, %cst_26 {dimension_numbers = #tpu.dot_dimension_numbers<[1], [0], [0], [1], [0, 0, 1, 1], [], []>} : vector<16x192xf32>, vector<192x6xf32>, vector<16x6xf32> -> vector<16x6xf32>
    %32 = vector.broadcast %12 : vector<16x1xf32> to vector<16x6xf32>
    %33 = arith.addf %32, %31 : vector<16x6xf32>
    %cst_27 = arith.constant 0.000000e+00 : f32
    %34 = vector.broadcast %cst_27 : f32 to vector<16x6xf32>
    %35 = arith.cmpf ogt, %33, %34 : vector<16x6xf32>
    %cst_28 = arith.constant 2.000000e-01 : f32
    %36 = vector.broadcast %cst_28 : f32 to vector<16x6xf32>
    %37 = arith.mulf %36, %33 : vector<16x6xf32>
    %38 = arith.select %35, %33, %37 : vector<16x6xi1>, vector<16x6xf32>
    %c0_29 = arith.constant 0 : index
    %c0_30 = arith.constant 0 : index
    %c0_31 = arith.constant 0 : index
    %39 = vector.load %arg3[%c0_29, %c0_30, %c0_31] : memref<2x16x4xf32, #tpu.memory_space<vmem>>, vector<1x16x4xf32>
    %40 = vector.shape_cast %39 : vector<1x16x4xf32> to vector<16x4xf32>
    %cst_32 = arith.constant dense<0.000000e+00> : vector<16xf32>
    %41 = vector.multi_reduction <add>, %40, %cst_32 [1] : vector<16x4xf32> to vector<16xf32>
    %42 = vector.shape_cast %41 : vector<16xf32> to vector<16x1xf32>
    %cst_33 = arith.constant 0.000000e+00 : f32
    %43 = vector.broadcast %cst_33 : f32 to vector<16x1xf32>
    %44 = arith.cmpf oeq, %42, %43 : vector<16x1xf32>
    %cst_34 = arith.constant 1.000000e+00 : f32
    %45 = vector.broadcast %cst_34 : f32 to vector<16x4xf32>
    %46 = vector.shape_cast %44 : vector<16x1xi1> to vector<16x1xi1>
    %47 = vector.broadcast %46 : vector<16x1xi1> to vector<16x4xi1>
    %48 = arith.select %47, %45, %40 : vector<16x4xi1>, vector<16x4xf32>
    %c0_35 = arith.constant 0 : index
    %c0_36 = arith.constant 0 : index
    %c0_37 = arith.constant 0 : index
    %49 = vector.load %arg5[%c0_35, %c0_36, %c0_37] : memref<2x16x6xf32, #tpu.memory_space<vmem>>, vector<1x16x6xf32>
    %50 = vector.shape_cast %49 : vector<1x16x6xf32> to vector<16x6xf32>
    %cst_38 = arith.constant dense<0.000000e+00> : vector<16xf32>
    %51 = vector.multi_reduction <add>, %50, %cst_38 [1] : vector<16x6xf32> to vector<16xf32>
    %52 = vector.shape_cast %51 : vector<16xf32> to vector<16x1xf32>
    %cst_39 = arith.constant 0.000000e+00 : f32
    %53 = vector.broadcast %cst_39 : f32 to vector<16x1xf32>
    %54 = arith.cmpf oeq, %52, %53 : vector<16x1xf32>
    %cst_40 = arith.constant 1.000000e+00 : f32
    %55 = vector.broadcast %cst_40 : f32 to vector<16x6xf32>
    %56 = vector.shape_cast %54 : vector<16x1xi1> to vector<16x1xi1>
    %57 = vector.broadcast %56 : vector<16x1xi1> to vector<16x6xi1>
    %58 = arith.select %57, %55, %50 : vector<16x6xi1>, vector<16x6xf32>
    %cst_41 = arith.constant 0.000000e+00 : f32
    %59 = vector.broadcast %cst_41 : f32 to vector<16x4xf32>
    %60 = arith.cmpf ogt, %48, %59 : vector<16x4xf32>
    %cst_42 = arith.constant -1.000000e+30 : f32
    %61 = vector.broadcast %cst_42 : f32 to vector<16x4xf32>
    %62 = arith.select %60, %28, %61 : vector<16x4xi1>, vector<16x4xf32>
    %cst_43 = arith.constant 0.000000e+00 : f32
    %63 = vector.broadcast %cst_43 : f32 to vector<16x6xf32>
    %64 = arith.cmpf ogt, %58, %63 : vector<16x6xf32>
    %cst_44 = arith.constant -1.000000e+30 : f32
    %65 = vector.broadcast %cst_44 : f32 to vector<16x6xf32>
    %66 = arith.select %64, %38, %65 : vector<16x6xi1>, vector<16x6xf32>
    %cst_45 = arith.constant dense<0xFF800000> : vector<16xf32>
    %67 = vector.multi_reduction <maximumf>, %62, %cst_45 [1] : vector<16x4xf32> to vector<16xf32>
    %68 = vector.shape_cast %67 : vector<16xf32> to vector<16x1xf32>
    %cst_46 = arith.constant dense<0xFF800000> : vector<16xf32>
    %69 = vector.multi_reduction <maximumf>, %66, %cst_46 [1] : vector<16x6xf32> to vector<16xf32>
    %70 = vector.shape_cast %69 : vector<16xf32> to vector<16x1xf32>
    %71 = arith.maximumf %68, %70 : vector<16x1xf32>
    %72 = vector.broadcast %71 : vector<16x1xf32> to vector<16x4xf32>
    %73 = arith.subf %62, %72 : vector<16x4xf32>
    %74 = math.exp %73 : vector<16x4xf32>
    %75 = vector.broadcast %71 : vector<16x1xf32> to vector<16x6xf32>
    %76 = arith.subf %66, %75 : vector<16x6xf32>
    %77 = math.exp %76 : vector<16x6xf32>
    %cst_47 = arith.constant dense<0.000000e+00> : vector<16xf32>
    %78 = vector.multi_reduction <add>, %74, %cst_47 [1] : vector<16x4xf32> to vector<16xf32>
    %79 = vector.shape_cast %78 : vector<16xf32> to vector<16x1xf32>
    %cst_48 = arith.constant dense<0.000000e+00> : vector<16xf32>
    %80 = vector.multi_reduction <add>, %77, %cst_48 [1] : vector<16x6xf32> to vector<16xf32>
    %81 = vector.shape_cast %80 : vector<16xf32> to vector<16x1xf32>
    %cst_49 = arith.constant dense<0.000000e+00> : vector<16x128xf32>
    %82 = tpu.matmul %74, %2, %cst_49 {dimension_numbers = #tpu.dot_dimension_numbers<[1], [0], [0], [1], [0, 0, 1, 1], [], []>} : vector<16x4xf32>, vector<4x128xf32>, vector<16x128xf32> -> vector<16x128xf32>
    %83 = arith.mulf %82, %15 : vector<16x128xf32>
    %cst_50 = arith.constant dense<0.000000e+00> : vector<16x32xf32>
    %84 = tpu.matmul %83, %4, %cst_50 {dimension_numbers = #tpu.dot_dimension_numbers<[1], [0], [0], [1], [0, 0, 1, 1], [], []>} : vector<16x128xf32>, vector<128x32xf32>, vector<16x32xf32> -> vector<16x32xf32>
    %cst_51 = arith.constant dense<0.000000e+00> : vector<16x192xf32>
    %85 = tpu.matmul %77, %3, %cst_51 {dimension_numbers = #tpu.dot_dimension_numbers<[1], [0], [0], [1], [0, 0, 1, 1], [], []>} : vector<16x6xf32>, vector<6x192xf32>, vector<16x192xf32> -> vector<16x192xf32>
    %86 = arith.mulf %85, %18 : vector<16x192xf32>
    %cst_52 = arith.constant dense<0.000000e+00> : vector<16x32xf32>
    %87 = tpu.matmul %86, %5, %cst_52 {dimension_numbers = #tpu.dot_dimension_numbers<[1], [0], [0], [1], [0, 0, 1, 1], [], []>} : vector<16x192xf32>, vector<192x32xf32>, vector<16x32xf32> -> vector<16x32xf32>
    %88 = tpu.reciprocal %79 {approx = true} : vector<16x1xf32> -> vector<16x1xf32>
    %89 = vector.broadcast %88 : vector<16x1xf32> to vector<16x32xf32>
    %90 = arith.mulf %84, %89 : vector<16x32xf32>
    %91 = tpu.reciprocal %81 {approx = true} : vector<16x1xf32> -> vector<16x1xf32>
    %92 = vector.broadcast %91 : vector<16x1xf32> to vector<16x32xf32>
    %93 = arith.mulf %87, %92 : vector<16x32xf32>
    %94 = arith.addf %84, %87 : vector<16x32xf32>
    %95 = arith.addf %79, %81 : vector<16x1xf32>
    %96 = tpu.reciprocal %95 {approx = true} : vector<16x1xf32> -> vector<16x1xf32>
    %97 = vector.broadcast %96 : vector<16x1xf32> to vector<16x32xf32>
    %98 = arith.mulf %94, %97 : vector<16x32xf32>
    %99 = tpu.concatenate %90, %93, %98 in 0 : vector<16x32xf32>, vector<16x32xf32>, vector<16x32xf32> -> vector<48x32xf32>
    %c0_53 = arith.constant 0 : index
    %c0_54 = arith.constant 0 : index
    %100 = vector.load %arg13[%c0_53, %c0_54] : memref<64x32xf32, #tpu.memory_space<vmem>>, vector<32x32xf32>
    %cst_55 = arith.constant dense<0.000000e+00> : vector<48x32xf32>
    %101 = tpu.matmul %99, %100, %cst_55 {dimension_numbers = #tpu.dot_dimension_numbers<[1], [0], [0], [1], [0, 0, 1, 1], [], []>} : vector<48x32xf32>, vector<32x32xf32>, vector<48x32xf32> -> vector<48x32xf32>
    %c0_56 = arith.constant 0 : index
    %c0_57 = arith.constant 0 : index
    %102 = vector.load %arg17[%c0_56, %c0_57] : memref<48x32xf32, #tpu.memory_space<vmem>>, vector<48x32xf32>
    tpu.vector_store %arg17[%c0_56, %c0_57], %101 {strides = array<i32>} : memref<48x32xf32, #tpu.memory_space<vmem>>, vector<48x32xf32>,
    %103 = vector.extract_strided_slice %1 {offsets = [1, 0], sizes = [1, 32], strides = [1, 1]} : vector<2x32xf32> to vector<1x32xf32>
    %104 = vector.shape_cast %103 : vector<1x32xf32> to vector<32xf32>
    %105 = vector.shape_cast %104 : vector<32xf32> to vector<1x32xf32>
    %106 = vector.broadcast %105 : vector<1x32xf32> to vector<16x32xf32>
    %107 = arith.mulf %0, %106 : vector<16x32xf32>
    %cst_58 = arith.constant dense<0.000000e+00> : vector<16xf32>
    %108 = vector.multi_reduction <add>, %107, %cst_58 [1] : vector<16x32xf32> to vector<16xf32>
    %109 = vector.shape_cast %108 : vector<16xf32> to vector<16x1xf32>
    %c1 = arith.constant 1 : index
    %c0_59 = arith.constant 0 : index
    %c0_60 = arith.constant 0 : index
    %110 = vector.load %arg2[%c1, %c0_59, %c0_60] : memref<2x16x128xbf16, #tpu.memory_space<vmem>>, vector<1x16x128xbf16>
    %111 = vector.shape_cast %110 : vector<1x16x128xbf16> to vector<16x128xbf16>
    %112 = arith.extf %111 : vector<16x128xbf16> to vector<16x128xf32>
    %c1_61 = arith.constant 1 : index
    %c0_62 = arith.constant 0 : index
    %c0_63 = arith.constant 0 : index
    %113 = vector.load %arg4[%c1_61, %c0_62, %c0_63] : memref<2x16x192xbf16, #tpu.memory_space<vmem>>, vector<1x16x192xbf16>
    %114 = vector.shape_cast %113 : vector<1x16x192xbf16> to vector<16x192xbf16>
    %115 = arith.extf %114 : vector<16x192xbf16> to vector<16x192xf32>
    %c1_64 = arith.constant 1 : index
    %c0_65 = arith.constant 0 : index
    %c0_66 = arith.constant 0 : index
    %116 = vector.load %arg7[%c1_64, %c0_65, %c0_66] : memref<2x128x4xf32, #tpu.memory_space<vmem>>, vector<1x128x4xf32>
    %117 = vector.shape_cast %116 : vector<1x128x4xf32> to vector<128x4xf32>
    %cst_67 = arith.constant dense<0.000000e+00> : vector<16x4xf32>
    %118 = tpu.matmul %112, %117, %cst_67 {dimension_numbers = #tpu.dot_dimension_numbers<[1], [0], [0], [1], [0, 0, 1, 1], [], []>} : vector<16x128xf32>, vector<128x4xf32>, vector<16x4xf32> -> vector<16x4xf32>
    %119 = vector.broadcast %109 : vector<16x1xf32> to vector<16x4xf32>
    %120 = arith.addf %119, %118 : vector<16x4xf32>
    %cst_68 = arith.constant 0.000000e+00 : f32
    %121 = vector.broadcast %cst_68 : f32 to vector<16x4xf32>
    %122 = arith.cmpf ogt, %120, %121 : vector<16x4xf32>
    %cst_69 = arith.constant 2.000000e-01 : f32
    %123 = vector.broadcast %cst_69 : f32 to vector<16x4xf32>
    %124 = arith.mulf %123, %120 : vector<16x4xf32>
    %125 = arith.select %122, %120, %124 : vector<16x4xi1>, vector<16x4xf32>
    %c1_70 = arith.constant 1 : index
    %c0_71 = arith.constant 0 : index
    %c0_72 = arith.constant 0 : index
    %126 = vector.load %arg8[%c1_70, %c0_71, %c0_72] : memref<2x192x6xf32, #tpu.memory_space<vmem>>, vector<1x192x6xf32>
    %127 = vector.shape_cast %126 : vector<1x192x6xf32> to vector<192x6xf32>
    %cst_73 = arith.constant dense<0.000000e+00> : vector<16x6xf32>
    %128 = tpu.matmul %115, %127, %cst_73 {dimension_numbers = #tpu.dot_dimension_numbers<[1], [0], [0], [1], [0, 0, 1, 1], [], []>} : vector<16x192xf32>, vector<192x6xf32>, vector<16x6xf32> -> vector<16x6xf32>
    %129 = vector.broadcast %109 : vector<16x1xf32> to vector<16x6xf32>
    %130 = arith.addf %129, %128 : vector<16x6xf32>
    %cst_74 = arith.constant 0.000000e+00 : f32
    %131 = vector.broadcast %cst_74 : f32 to vector<16x6xf32>
    %132 = arith.cmpf ogt, %130, %131 : vector<16x6xf32>
    %cst_75 = arith.constant 2.000000e-01 : f32
    %133 = vector.broadcast %cst_75 : f32 to vector<16x6xf32>
    %134 = arith.mulf %133, %130 : vector<16x6xf32>
    %135 = arith.select %132, %130, %134 : vector<16x6xi1>, vector<16x6xf32>
    %c1_76 = arith.constant 1 : index
    %c0_77 = arith.constant 0 : index
    %c0_78 = arith.constant 0 : index
    %136 = vector.load %arg3[%c1_76, %c0_77, %c0_78] : memref<2x16x4xf32, #tpu.memory_space<vmem>>, vector<1x16x4xf32>
    %137 = vector.shape_cast %136 : vector<1x16x4xf32> to vector<16x4xf32>
    %cst_79 = arith.constant dense<0.000000e+00> : vector<16xf32>
    %138 = vector.multi_reduction <add>, %137, %cst_79 [1] : vector<16x4xf32> to vector<16xf32>
    %139 = vector.shape_cast %138 : vector<16xf32> to vector<16x1xf32>
    %cst_80 = arith.constant 0.000000e+00 : f32
    %140 = vector.broadcast %cst_80 : f32 to vector<16x1xf32>
    %141 = arith.cmpf oeq, %139, %140 : vector<16x1xf32>
    %cst_81 = arith.constant 1.000000e+00 : f32
    %142 = vector.broadcast %cst_81 : f32 to vector<16x4xf32>
    %143 = vector.shape_cast %141 : vector<16x1xi1> to vector<16x1xi1>
    %144 = vector.broadcast %143 : vector<16x1xi1> to vector<16x4xi1>
    %145 = arith.select %144, %142, %137 : vector<16x4xi1>, vector<16x4xf32>
    %c1_82 = arith.constant 1 : index
    %c0_83 = arith.constant 0 : index
    %c0_84 = arith.constant 0 : index
    %146 = vector.load %arg5[%c1_82, %c0_83, %c0_84] : memref<2x16x6xf32, #tpu.memory_space<vmem>>, vector<1x16x6xf32>
    %147 = vector.shape_cast %146 : vector<1x16x6xf32> to vector<16x6xf32>
    %cst_85 = arith.constant dense<0.000000e+00> : vector<16xf32>
    %148 = vector.multi_reduction <add>, %147, %cst_85 [1] : vector<16x6xf32> to vector<16xf32>
    %149 = vector.shape_cast %148 : vector<16xf32> to vector<16x1xf32>
    %cst_86 = arith.constant 0.000000e+00 : f32
    %150 = vector.broadcast %cst_86 : f32 to vector<16x1xf32>
    %151 = arith.cmpf oeq, %149, %150 : vector<16x1xf32>
    %cst_87 = arith.constant 1.000000e+00 : f32
    %152 = vector.broadcast %cst_87 : f32 to vector<16x6xf32>
    %153 = vector.shape_cast %151 : vector<16x1xi1> to vector<16x1xi1>
    %154 = vector.broadcast %153 : vector<16x1xi1> to vector<16x6xi1>
    %155 = arith.select %154, %152, %147 : vector<16x6xi1>, vector<16x6xf32>
    %cst_88 = arith.constant 0.000000e+00 : f32
    %156 = vector.broadcast %cst_88 : f32 to vector<16x4xf32>
    %157 = arith.cmpf ogt, %145, %156 : vector<16x4xf32>
    %cst_89 = arith.constant -1.000000e+30 : f32
    %158 = vector.broadcast %cst_89 : f32 to vector<16x4xf32>
    %159 = arith.select %157, %125, %158 : vector<16x4xi1>, vector<16x4xf32>
    %cst_90 = arith.constant 0.000000e+00 : f32
    %160 = vector.broadcast %cst_90 : f32 to vector<16x6xf32>
    %161 = arith.cmpf ogt, %155, %160 : vector<16x6xf32>
    %cst_91 = arith.constant -1.000000e+30 : f32
    %162 = vector.broadcast %cst_91 : f32 to vector<16x6xf32>
    %163 = arith.select %161, %135, %162 : vector<16x6xi1>, vector<16x6xf32>
    %cst_92 = arith.constant dense<0xFF800000> : vector<16xf32>
    %164 = vector.multi_reduction <maximumf>, %159, %cst_92 [1] : vector<16x4xf32> to vector<16xf32>
    %165 = vector.shape_cast %164 : vector<16xf32> to vector<16x1xf32>
    %cst_93 = arith.constant dense<0xFF800000> : vector<16xf32>
    %166 = vector.multi_reduction <maximumf>, %163, %cst_93 [1] : vector<16x6xf32> to vector<16xf32>
    %167 = vector.shape_cast %166 : vector<16xf32> to vector<16x1xf32>
    %168 = arith.maximumf %165, %167 : vector<16x1xf32>
    %169 = vector.broadcast %168 : vector<16x1xf32> to vector<16x4xf32>
    %170 = arith.subf %159, %169 : vector<16x4xf32>
    %171 = math.exp %170 : vector<16x4xf32>
    %172 = vector.broadcast %168 : vector<16x1xf32> to vector<16x6xf32>
    %173 = arith.subf %163, %172 : vector<16x6xf32>
    %174 = math.exp %173 : vector<16x6xf32>
    %cst_94 = arith.constant dense<0.000000e+00> : vector<16xf32>
    %175 = vector.multi_reduction <add>, %171, %cst_94 [1] : vector<16x4xf32> to vector<16xf32>
    %176 = vector.shape_cast %175 : vector<16xf32> to vector<16x1xf32>
    %cst_95 = arith.constant dense<0.000000e+00> : vector<16xf32>
    %177 = vector.multi_reduction <add>, %174, %cst_95 [1] : vector<16x6xf32> to vector<16xf32>
    %178 = vector.shape_cast %177 : vector<16xf32> to vector<16x1xf32>
    %cst_96 = arith.constant dense<0.000000e+00> : vector<16x128xf32>
    %179 = tpu.matmul %171, %2, %cst_96 {dimension_numbers = #tpu.dot_dimension_numbers<[1], [0], [0], [1], [0, 0, 1, 1], [], []>} : vector<16x4xf32>, vector<4x128xf32>, vector<16x128xf32> -> vector<16x128xf32>
    %180 = arith.mulf %179, %112 : vector<16x128xf32>
    %cst_97 = arith.constant dense<0.000000e+00> : vector<16x32xf32>
    %181 = tpu.matmul %180, %4, %cst_97 {dimension_numbers = #tpu.dot_dimension_numbers<[1], [0], [0], [1], [0, 0, 1, 1], [], []>} : vector<16x128xf32>, vector<128x32xf32>, vector<16x32xf32> -> vector<16x32xf32>
    %cst_98 = arith.constant dense<0.000000e+00> : vector<16x192xf32>
    %182 = tpu.matmul %174, %3, %cst_98 {dimension_numbers = #tpu.dot_dimension_numbers<[1], [0], [0], [1], [0, 0, 1, 1], [], []>} : vector<16x6xf32>, vector<6x192xf32>, vector<16x192xf32> -> vector<16x192xf32>
    %183 = arith.mulf %182, %115 : vector<16x192xf32>
    %cst_99 = arith.constant dense<0.000000e+00> : vector<16x32xf32>
    %184 = tpu.matmul %183, %5, %cst_99 {dimension_numbers = #tpu.dot_dimension_numbers<[1], [0], [0], [1], [0, 0, 1, 1], [], []>} : vector<16x192xf32>, vector<192x32xf32>, vector<16x32xf32> -> vector<16x32xf32>
    %185 = tpu.reciprocal %176 {approx = true} : vector<16x1xf32> -> vector<16x1xf32>
    %186 = vector.broadcast %185 : vector<16x1xf32> to vector<16x32xf32>
    %187 = arith.mulf %181, %186 : vector<16x32xf32>
    %188 = tpu.reciprocal %178 {approx = true} : vector<16x1xf32> -> vector<16x1xf32>
    %189 = vector.broadcast %188 : vector<16x1xf32> to vector<16x32xf32>
    %190 = arith.mulf %184, %189 : vector<16x32xf32>
    %191 = arith.addf %181, %184 : vector<16x32xf32>
    %192 = arith.addf %176, %178 : vector<16x1xf32>
    %193 = tpu.reciprocal %192 {approx = true} : vector<16x1xf32> -> vector<16x1xf32>
    %194 = vector.broadcast %193 : vector<16x1xf32> to vector<16x32xf32>
    %195 = arith.mulf %191, %194 : vector<16x32xf32>
    %196 = tpu.concatenate %187, %190, %195 in 0 : vector<16x32xf32>, vector<16x32xf32>, vector<16x32xf32> -> vector<48x32xf32>
    %c32 = arith.constant 32 : index
    %c0_100 = arith.constant 0 : index
    %197 = vector.load %arg13[%c32, %c0_100] : memref<64x32xf32, #tpu.memory_space<vmem>>, vector<32x32xf32>
    %cst_101 = arith.constant dense<0.000000e+00> : vector<48x32xf32>
    %198 = tpu.matmul %196, %197, %cst_101 {dimension_numbers = #tpu.dot_dimension_numbers<[1], [0], [0], [1], [0, 0, 1, 1], [], []>} : vector<48x32xf32>, vector<32x32xf32>, vector<48x32xf32> -> vector<48x32xf32>
    %c0_102 = arith.constant 0 : index
    %c0_103 = arith.constant 0 : index
    %199 = vector.load %arg17[%c0_102, %c0_103] : memref<48x32xf32, #tpu.memory_space<vmem>>, vector<48x32xf32>
    %200 = arith.addf %199, %198 : vector<48x32xf32>
    %c0_104 = arith.constant 0 : index
    %c0_105 = arith.constant 0 : index
    %201 = vector.load %arg17[%c0_104, %c0_105] : memref<48x32xf32, #tpu.memory_space<vmem>>, vector<48x32xf32>
    tpu.vector_store %arg17[%c0_104, %c0_105], %200 {strides = array<i32>} : memref<48x32xf32, #tpu.memory_space<vmem>>, vector<48x32xf32>,
    %c0_106 = arith.constant 0 : index
    %c0_107 = arith.constant 0 : index
    %202 = vector.load %arg17[%c0_106, %c0_107] : memref<48x32xf32, #tpu.memory_space<vmem>>, vector<48x32xf32>
    %203 = vector.extract_strided_slice %202 {offsets = [0, 0], sizes = [16, 32], strides = [1, 1]} : vector<48x32xf32> to vector<16x32xf32>
    %c0_108 = arith.constant 0 : index
    %c0_109 = arith.constant 0 : index
    %204 = vector.load %arg14[%c0_108, %c0_109] : memref<16x32xf32, #tpu.memory_space<vmem>>, vector<16x32xf32>
    tpu.vector_store %arg14[%c0_108, %c0_109], %203 {strides = array<i32>} : memref<16x32xf32, #tpu.memory_space<vmem>>, vector<16x32xf32>,
    %205 = vector.extract_strided_slice %202 {offsets = [16, 0], sizes = [16, 32], strides = [1, 1]} : vector<48x32xf32> to vector<16x32xf32>
    %c0_110 = arith.constant 0 : index
    %c0_111 = arith.constant 0 : index
    %206 = vector.load %arg15[%c0_110, %c0_111] : memref<16x32xf32, #tpu.memory_space<vmem>>, vector<16x32xf32>
    tpu.vector_store %arg15[%c0_110, %c0_111], %205 {strides = array<i32>} : memref<16x32xf32, #tpu.memory_space<vmem>>, vector<16x32xf32>,
    %207 = vector.extract_strided_slice %202 {offsets = [32, 0], sizes = [16, 32], strides = [1, 1]} : vector<48x32xf32> to vector<16x32xf32>
    %c0_112 = arith.constant 0 : index
    %c0_113 = arith.constant 0 : index
    %208 = vector.load %arg16[%c0_112, %c0_113] : memref<16x32xf32, #tpu.memory_space<vmem>>, vector<16x32xf32>
    tpu.vector_store %arg16[%c0_112, %c0_113], %207 {strides = array<i32>} : memref<16x32xf32, #tpu.memory_space<vmem>>, vector<16x32xf32>,
    return
  }
  func.func @transform_0(%arg0: i32) -> (i32, i32) {
    %c0_i32 = arith.constant 0 : i32
    %c0_i32_0 = arith.constant 0 : i32
    return %arg0, %c0_i32 : i32, i32
  }
  func.func @transform_1(%arg0: i32) -> (i32, i32, i32) {
    %c0_i32 = arith.constant 0 : i32
    %c0_i32_0 = arith.constant 0 : i32
    %c0_i32_1 = arith.constant 0 : i32
    return %c0_i32, %arg0, %c0_i32_0 : i32, i32, i32
  }
  func.func @transform_2(%arg0: i32) -> (i32, i32, i32) {
    %c0_i32 = arith.constant 0 : i32
    %c0_i32_0 = arith.constant 0 : i32
    %c0_i32_1 = arith.constant 0 : i32
    return %c0_i32, %arg0, %c0_i32_0 : i32, i32, i32
  }
  func.func @transform_3(%arg0: i32) -> (i32, i32, i32) {
    %c0_i32 = arith.constant 0 : i32
    %c0_i32_0 = arith.constant 0 : i32
    %c0_i32_1 = arith.constant 0 : i32
    return %c0_i32, %arg0, %c0_i32_0 : i32, i32, i32
  }
  func.func @transform_4(%arg0: i32) -> (i32, i32, i32) {
    %c0_i32 = arith.constant 0 : i32
    %c0_i32_0 = arith.constant 0 : i32
    %c0_i32_1 = arith.constant 0 : i32
    return %c0_i32, %arg0, %c0_i32_0 : i32, i32, i32
  }
  func.func @transform_5(%arg0: i32) -> (i32, i32) {
    %c0_i32 = arith.constant 0 : i32
    %c0_i32_0 = arith.constant 0 : i32
    %c0_i32_1 = arith.constant 0 : i32
    return %c0_i32, %c0_i32_0 : i32, i32
  }
  func.func @transform_6(%arg0: i32) -> (i32, i32, i32) {
    %c0_i32 = arith.constant 0 : i32
    %c0_i32_0 = arith.constant 0 : i32
    %c0_i32_1 = arith.constant 0 : i32
    %c0_i32_2 = arith.constant 0 : i32
    return %c0_i32, %c0_i32_0, %c0_i32_1 : i32, i32, i32
  }
  func.func @transform_7(%arg0: i32) -> (i32, i32, i32) {
    %c0_i32 = arith.constant 0 : i32
    %c0_i32_0 = arith.constant 0 : i32
    %c0_i32_1 = arith.constant 0 : i32
    %c0_i32_2 = arith.constant 0 : i32
    return %c0_i32, %c0_i32_0, %c0_i32_1 : i32, i32, i32
  }
  func.func @transform_8(%arg0: i32) -> (i32, i32) {
    %c0_i32 = arith.constant 0 : i32
    %c0_i32_0 = arith.constant 0 : i32
    %c0_i32_1 = arith.constant 0 : i32
    return %c0_i32, %c0_i32_0 : i32, i32
  }
  func.func @transform_9(%arg0: i32) -> (i32, i32) {
    %c0_i32 = arith.constant 0 : i32
    %c0_i32_0 = arith.constant 0 : i32
    %c0_i32_1 = arith.constant 0 : i32
    return %c0_i32, %c0_i32_0 : i32, i32
  }
  func.func @transform_10(%arg0: i32) -> (i32, i32) {
    %c0_i32 = arith.constant 0 : i32
    %c0_i32_0 = arith.constant 0 : i32
    %c0_i32_1 = arith.constant 0 : i32
    return %c0_i32, %c0_i32_0 : i32, i32
  }
  func.func @transform_11(%arg0: i32) -> (i32, i32) {
    %c0_i32 = arith.constant 0 : i32
    %c0_i32_0 = arith.constant 0 : i32
    %c0_i32_1 = arith.constant 0 : i32
    return %c0_i32, %c0_i32_0 : i32, i32
  }
  func.func @transform_12(%arg0: i32) -> (i32, i32) {
    %c0_i32 = arith.constant 0 : i32
    %c0_i32_0 = arith.constant 0 : i32
    %c0_i32_1 = arith.constant 0 : i32
    return %c0_i32, %c0_i32_0 : i32, i32
  }
  func.func @transform_13(%arg0: i32) -> (i32, i32) {
    %c0_i32 = arith.constant 0 : i32
    %c0_i32_0 = arith.constant 0 : i32
    return %arg0, %c0_i32 : i32, i32
  }
  func.func @transform_14(%arg0: i32) -> (i32, i32) {
    %c0_i32 = arith.constant 0 : i32
    %c0_i32_0 = arith.constant 0 : i32
    return %arg0, %c0_i32 : i32, i32
  }
  func.func @transform_15(%arg0: i32) -> (i32, i32) {
    %c0_i32 = arith.constant 0 : i32
    %c0_i32_0 = arith.constant 0 : i32
    return %arg0, %c0_i32 : i32, i32
  }
}

</mosaic_0001>

<bundles_post_ra>
// kernel: tpu_custom_call.1
= control target key start
LH: loop header
LB: loop body
LE: loop exit
PB: predicated region body
PF: predicated region fallthrough
CT: control target
= control target key end

     0   :  { %s4396_s0 = inlined_call_operand.vmem [shape: f32[128,32], index: 0, kind: input, shape index: {}]   ;;  %s4397_s1 = inlined_call_operand.vmem [shape: bf16[2,128,128], index: 1, kind: input, shape index: {}]   ;;  %s4398_s2 = inlined_call_operand.vmem [shape: f32[2,128,4], index: 2, kind: input, shape index: {}]   ;;  %s4399_s3 = inlined_call_operand.vmem [shape: bf16[2,128,192], index: 3, kind: input, shape index: {}]   ;;  %s4400_s4 = inlined_call_operand.vmem [shape: f32[2,128,6], index: 4, kind: input, shape index: {}]   ;;  %s4401_s5 = inlined_call_operand.vmem [shape: f32[2,32], index: 5, kind: input, shape index: {}]   ;;  %s4402_s6 = inlined_call_operand.vmem [shape: f32[2,128,4], index: 6, kind: input, shape index: {}]   ;;  %s4403_s7 = inlined_call_operand.vmem [shape: f32[2,192,6], index: 7, kind: input, shape index: {}]   ;;  %s4404_s8 = inlined_call_operand.vmem [shape: f32[4,128], index: 8, kind: input, shape index: {}]   ;;  %s4405_s9 = inlined_call_operand.vmem [shape: f32[6,192], index: 9, kind: input, shape index: {}]   ;;  %s4406_s10 = inlined_call_operand.vmem [shape: f32[128,32], index: 10, kind: input, shape index: {}]   ;;  %s4407_s11 = inlined_call_operand.vmem [shape: f32[192,32], index: 11, kind: input, shape index: {}]   ;;  %s4408_s12 = inlined_call_operand.vmem [shape: f32[64,32], index: 12, kind: input, shape index: {}]   ;;  %s4409_s13 = inlined_call_operand.vmem [shape: f32[128,32], index: 13, kind: output, shape index: {0}]   ;;  %s4410_s14 = inlined_call_operand.vmem [shape: f32[128,32], index: 14, kind: output, shape index: {1}]   ;;  %s4411_s15 = inlined_call_operand.vmem [shape: f32[128,32], index: 15, kind: output, shape index: {2}]  }
   0x1   :  { %4415 = sst [smem:[#allocation9_spill]] %s4411_s15 }
   0x2   :  { %s3516_s18 = smov 0   ;;  %s3518_s19 = smov 0  }
   0x3   :  { %s3520_s20 = smov 0  }
   0x4 LB: > { %s3533_s22 = sadd.s32 1, %s3432_s20   ;;  %s59_s24 = sadd.s32 1, %s3428_s19  ;;  %s3432_s20 = sphi %s3520_s20, %s4422_s20   ;;  %s3428_s19 = sphi %s3518_s19, %s4425_s19   ;;  %s3424_s18 = sphi %s3516_s18, %s4424_s18  }
   0x5   : > { %4416 = sst [smem:[#allocation7_spill]] %s3533_s22  ;;  %s56_s23 = ssub.s32 %s3432_s20, %s3533_s22 }
   0x6   : > { %p57_p0 = scmp.eq.s32.totalorder %s56_s23, 0  ;;  %p66_p1 = scmp.ne.s32.totalorder %s3428_s19, %s3424_s18 }
   0x7   : > { %p67_p2 = scmp.eq.s32.totalorder %s3432_s20, 0  ;;  %p2649_p4 = scmp.ge.s32.totalorder %s3432_s20, 8 }
   0x8   : > { %s3542_s25 = scalar_select %p57_p0, %s3428_s19, %s59_s24  }
   0x9   : > { %p3544_p3 = por %p67_p2, %p66_p1  ;;  %440 = sbr.rel (%p2649_p4) target bundleno = 44 (0x2c), region = 48 }
   0xa   : > { %4417 = sst [smem:[#allocation8_spill]] %s3542_s25 }
  0x10   : > { %452 = sbr.rel (!%p3544_p3) target bundleno = 23 (0x17), region = 56  ;;  %s454_s27 = sand.u32 (%p3544_p3), 1, %s3428_s19  }
  0x11   : > { %s2760_s28 = sshll.u32 (%p3544_p3), %s3432_s20, 3  ;;  %s2650_s29 = sshll.u32 (%p3544_p3), %s454_s27, 4 }
  0x12   : > { %s459_s17 = scalar_lea.vmem (%p3544_p3), %s4397_s1, %s2760_s28  ;;  %s456_s23 = scalar_lea.vmem (%p3544_p3), [#allocation3], %s2650_s29 }
  0x13   : > { %v475_v0 = vld [vmem:[%s459_s17] sm:$0xff] (%p3544_p3)  }
  0x14   : > { %v479_v1 = vld [vmem:[%s459_s17 + $0x40] sm:$0xff] (%p3544_p3)   ;;  %476 = vst [vmem:[%s456_s23] sm:$0xff] (%p3544_p3), %v475_v0  }
  0x15   : > { %480 = vst [vmem:[%s456_s23 + $0x8] sm:$0xff] (%p3544_p3), %v479_v1  }
  0x17 PF: > { %513 = sbr.rel (!%p3544_p3) target bundleno = 30 (0x1e), region = 97  ;;  %s515_s24 = sand.u32 (%p3544_p3), 1, %s3428_s19  }
  0x18   : > { %s2761_s21 = sshll.u32 (%p3544_p3), %s3432_s20, 4  ;;  %s2653_s25 = sshll.u32 (%p3544_p3), %s515_s24, 5 }
  0x19   : > { %s520_s15 = scalar_lea.vmem (%p3544_p3), %s4398_s2, %s2761_s21  ;;  %s517_s28 = scalar_lea.vmem (%p3544_p3), [#allocation4], %s2653_s25 }
  0x1a   : > { %v554_v2 = vld [vmem:[%s520_s15] sm:$0xff] (%p3544_p3)  ;;  %v556_v3 = vld [vmem:[%s520_s15 + $0x8] sm:$0xff] (%p3544_p3) }
  0x1b   : > { %v558_v4 = vld [vmem:[%s520_s15 + $0x80] sm:$0xff] (%p3544_p3)  ;;  %555 = vst [vmem:[%s517_s28] sm:$0xff] (%p3544_p3), %v554_v2  ;;  %557 = vst [vmem:[%s517_s28 + $0x8] sm:$0xff] (%p3544_p3), %v556_v3  ;;  %v560_v5 = vld [vmem:[%s520_s15 + $0x88] sm:$0xff] (%p3544_p3) }
  0x1c   : > { %559 = vst [vmem:[%s517_s28 + $0x10] sm:$0xff] (%p3544_p3), %v558_v4  ;;  %561 = vst [vmem:[%s517_s28 + $0x18] sm:$0xff] (%p3544_p3), %v560_v5 }
  0x1e PF: > { %567 = sbr.rel (!%p3544_p3) target bundleno = 37 (0x25), region = 135  ;;  %s569_s29 = sand.u32 (%p3544_p3), 1, %s3428_s19  }
  0x1f   : > { %s2763_s30 = sshll.u32 (%p3544_p3), %s3432_s20, 4  ;;  %s2656_s16 = sshll.u32 (%p3544_p3), %s569_s29, 5 }
  0x20   : > { %s575_s17 = scalar_lea.vmem (%p3544_p3), %s4399_s3, %s2763_s30  ;;  %s571_s25 = scalar_lea.vmem (%p3544_p3), [#allocation5], %s2656_s16 }
  0x21   : > { %v609_v6 = vld [vmem:[%s575_s17] sm:$0xff] (%p3544_p3)  ;;  %v611_v7 = vld [vmem:[%s575_s17 + $0x8] sm:$0xff] (%p3544_p3) }
  0x22   : > { %v613_v8 = vld [vmem:[%s575_s17 + $0x80] sm:$0xff] (%p3544_p3)  ;;  %610 = vst [vmem:[%s571_s25] sm:$0xff] (%p3544_p3), %v609_v6  ;;  %612 = vst [vmem:[%s571_s25 + $0x8] sm:$0xff] (%p3544_p3), %v611_v7  ;;  %v615_v9 = vld [vmem:[%s575_s17 + $0x88] sm:$0xff] (%p3544_p3) }
  0x23   : > { %614 = vst [vmem:[%s571_s25 + $0x10] sm:$0xff] (%p3544_p3), %v613_v8  ;;  %616 = vst [vmem:[%s571_s25 + $0x18] sm:$0xff] (%p3544_p3), %v615_v9 }
  0x25 PF: > { %622 = sbr.rel (!%p3544_p3) target bundleno = 44 (0x2c), region = 173  ;;  %s624_s15 = sand.u32 (%p3544_p3), 1, %s3428_s19  }
  0x26   : > { %s2764_s23 = sshll.u32 (%p3544_p3), %s3432_s20, 4  ;;  %s2660_s24 = sshll.u32 (%p3544_p3), %s624_s15, 5 }
  0x27   : > { %s629_s29 = scalar_lea.vmem (%p3544_p3), %s4400_s4, %s2764_s23  ;;  %s626_s30 = scalar_lea.vmem (%p3544_p3), [#allocation6], %s2660_s24 }
  0x28   : > { %v663_v10 = vld [vmem:[%s629_s29] sm:$0xff] (%p3544_p3)  ;;  %v665_v11 = vld [vmem:[%s629_s29 + $0x8] sm:$0xff] (%p3544_p3) }
  0x29   : > { %v667_v12 = vld [vmem:[%s629_s29 + $0x80] sm:$0xff] (%p3544_p3)  ;;  %664 = vst [vmem:[%s626_s30] sm:$0xff] (%p3544_p3), %v663_v10  ;;  %666 = vst [vmem:[%s626_s30 + $0x8] sm:$0xff] (%p3544_p3), %v665_v11  ;;  %v669_v13 = vld [vmem:[%s629_s29 + $0x88] sm:$0xff] (%p3544_p3) }
  0x2a   : > { %668 = vst [vmem:[%s626_s30 + $0x10] sm:$0xff] (%p3544_p3), %v667_v12  ;;  %670 = vst [vmem:[%s626_s30 + $0x18] sm:$0xff] (%p3544_p3), %v669_v13 }
  0x2c PF: > { %p2663_p5 = scmp.ge.s32.totalorder %s3432_s20, 1  ;;  %p675_p6 = scmp.lt.s32.totalorder %s3432_s20, 9 }
  0x2e   : > { %p676_p7 = pnand %p2663_p5, %p675_p6 }
  0x2f   : > { %v973_v14 = vld [vmem:[%s4403_s7] sm:$0xff] (!%p676_p7)  ;;  %v974_v15 = vld [vmem:[%s4403_s7 + $0x8] sm:$0xff] (!%p676_p7)  ;;  %v975_v16 = vld [vmem:[%s4403_s7 + $0x10] sm:$0xff] (!%p676_p7)  ;;  %v3434_v17 = vmov (!%p676_p7), 0.0|0.0   ;;  %s682_s16 = sand.u32 (!%p676_p7), 1, %s3424_s18   ;;  %s4419_s15 = sadd.s32 (!%p676_p7), 4294967295, %s3432_s20   ;;  %v851_v31 = vlaneseq (!%p676_p7) }
  0x30   : > { %679 = sbr.rel (%p676_p7) target bundleno = 2223 (0x8af), region = 211  ;;  %3088 = vmatprep.subr.bf16.mxu1 (!%p676_p7), %v3434_v17  ;;  %v3089_v18 = vpack.c.bf16 (!%p676_p7), %v974_v15, %v973_v14  ;;  %v976_v19 = vld [vmem:[%s4403_s7 + $0x18] sm:$0xff] (!%p676_p7)  ;;  %v874_v20 = vld [vmem:[%s4402_s6] sm:$0xff] (!%p676_p7)  ;;  %v875_v21 = vld [vmem:[%s4402_s6 + $0x8] sm:$0xff] (!%p676_p7)  ;;  %s2668_s23 = sshll.u32 (!%p676_p7), %s4419_s15, 1  ;;  %vm1089_vm0 = vcmask (!%p676_p7), 31744  }
  0x31   : > { %v3056_v22 = vpack.c.bf16 (!%p676_p7), %v875_v21, %v874_v20  ;;  %v876_v23 = vld [vmem:[%s4402_s6 + $0x10] sm:$0xff] (!%p676_p7)  ;;  %v3092_v24 = vpack.c.bf16 (!%p676_p7), %v976_v19, %v975_v16  ;;  %v977_v25 = vld [vmem:[%s4403_s7 + $0x20] sm:$0xff] (!%p676_p7)  ;;  %v877_v26 = vld [vmem:[%s4402_s6 + $0x18] sm:$0xff] (!%p676_p7)  ;;  %p778_p8 = scmp.lt.s32.totalorder (!%p676_p7), %s2668_s23, 15  ;;  %s3620_s20 = sshll.u32 (!%p676_p7), %s682_s16, 4  ;;  %v3639_v38 = vshrl.u32 (!%p676_p7), %v851_v31, 7 }
  0x32   : > { %3090 = vmatpush1.bf16.msra.mxu1 (!%p676_p7), %v3089_v18  ;;  %v978_v27 = vld [vmem:[%s4403_s7 + $0x28] sm:$0xff] (!%p676_p7)  ;;  %v3060_v28 = vpack.c.bf16 (!%p676_p7), %v877_v26, %v876_v23  ;;  %v878_v29 = vld [vmem:[%s4402_s6 + $0x20] sm:$0xff] (!%p676_p7)  ;;  %v880_v34 = vld [vmem:[%s4402_s6 + $0x30] sm:$0xff] (!%p676_p7)  ;;  %s3635_s18 = sshll.u32 (!%p676_p7), %s682_s16, 5  ;;  %s4414_s27 = scalar_lea.vmem (!%p676_p7), [#allocation3], %s3620_s20  ;;  %vm997_vm1 = vcmask (!%p676_p7), 523264  }
  0x33   : > { %3091 = vmatprep.subr.bf16.mxu1 (!%p676_p7), %v3434_v17  ;;  %3057 = vmatprep.subr.bf16.mxu0 (!%p676_p7), %v3056_v22  ;;  %v879_v30 = vld [vmem:[%s4402_s6 + $0x28] sm:$0xff] (!%p676_p7)  ;;  %v3095_v33 = vpack.c.bf16 (!%p676_p7), %v978_v27, %v977_v25  ;;  %v881_v35 = vld [vmem:[%s4402_s6 + $0x38] sm:$0xff] (!%p676_p7)  ;;  %v979_v36 = vld [vmem:[%s4403_s7 + $0x30] sm:$0xff] (!%p676_p7)  ;;  %v853_v46 = vsub.s32 (!%p676_p7), 0, %v3639_v38  ;;  %s3672_s16 = scalar_lea.vmem (!%p676_p7), [#allocation5], %s3635_s18  ;;  %s3690_s25 = scalar_lea.vmem (!%p676_p7), [#allocation4], %s3635_s18 }
  0x34   : > { %3059 = vmatpush3.bf16.msra.mxu0 (!%p676_p7), %v3056_v22  ;;  %v3064_v32 = vpack.c.bf16 (!%p676_p7), %v879_v30, %v878_v29  ;;  %v980_v37 = vld [vmem:[%s4403_s7 + $0x38] sm:$0xff] (!%p676_p7)  ;;  %v3068_v39 = vpack.c.bf16 (!%p676_p7), %v881_v35, %v880_v34  ;;  %v882_v41 = vld [vmem:[%s4402_s6 + $0x40] sm:$0xff] (!%p676_p7)  ;;  %v883_v42 = vld [vmem:[%s4402_s6 + $0x48] sm:$0xff] (!%p676_p7)  ;;  %vm1106_vm2 = vcmask (!%p676_p7), 48128   ;;  %vm857_vm3 = vcmask (!%p676_p7), 261120  }
  0x35   : > { %3061 = vmatprep.subr.bf16.mxu0 (!%p676_p7), %v3060_v28  ;;  %v3098_v40 = vpack.c.bf16 (!%p676_p7), %v980_v37, %v979_v36  ;;  %v981_v43 = vld [vmem:[%s4403_s7 + $0x40] sm:$0xff] (!%p676_p7)  ;;  %v982_v44 = vld [vmem:[%s4403_s7 + $0x48] sm:$0xff] (!%p676_p7)  ;;  %v884_v47 = vld [vmem:[%s4402_s6 + $0x50] sm:$0xff] (!%p676_p7)  ;;  %v3072_v49 = vpack.c.bf16 (!%p676_p7), %v883_v42, %v882_v41 }
  0x36   : > { %3093 = vmatpush1.bf16.msra.mxu1 (!%p676_p7), %v3092_v24  ;;  %v3661_v45 = vld [vmem:[%s4414_s27] sm:$0xff] (!%p676_p7)   ;;  %v885_v50 = vld [vmem:[%s4402_s6 + $0x58] sm:$0xff] (!%p676_p7)  ;;  %v3101_v53 = vpack.c.bf16 (!%p676_p7), %v982_v44, %v981_v43  ;;  %v887_v4 = vld [vmem:[%s4402_s6 + $0x68] sm:$0xff] (!%p676_p7)  ;;  %s4420_s27 = scalar_lea.vmem (!%p676_p7), [#allocation3], %s3620_s20 }
  0x37   : > { %s4427_s23 = smov (!%p778_p8, %s2668_s23), 15  ;;  %3094 = vmatprep.subr.bf16.mxu1 %v3434_v17  ;;  %v2767_v48 = vunpack.c.l.bf16 %v3661_v45  ;;  %v3675_v51 = vld [vmem:[%s3672_s16] sm:$0xff]  ;;  %v3685_v55 = vld [vmem:[%s4401_s5] sm:$0x3]  ;;  %v984_v59 = vld [vmem:[%s4403_s7 + $0x58] sm:$0xff]  ;;  %v3076_v63 = vpack.c.bf16 %v885_v50, %v884_v47 }
  0x38   : > { %s3637_s28 = sshll.u32 %s4427_s23, 3  ;;  %3063 = vmatpush3.bf16.msra.mxu0 %v3060_v28  ;;  %v871_v54 = vunpack.c.h.bf16 %v3675_v51  ;;  %v3693_v57 = vld [vmem:[%s3690_s25] sm:$0xff]  ;;  %v854_v60 = vrot.slane %v3685_v55, %v853_v46  ;;  %v886_v3 = vld [vmem:[%s4402_s6 + $0x60] sm:$0xff]  ;;  %v986_v7 = vld [vmem:[%s4403_s7 + $0x68] sm:$0xff]  ;;  %v2768_v28 = vunpack.c.h.bf16 %v3661_v45  ;;  %v870_v37 = vunpack.c.l.bf16 %v3675_v51 }
  0x39   : > { %3065 = vmatprep.subr.bf16.mxu0 %v3064_v32  ;;  %s781_s21 = scalar_lea.vmem %s4396_s0, %s3637_s28  ;;  %2904 = vmatprep.mubr.f32.mxu0 %v2767_v48  ;;  %v983_v58 = vld [vmem:[%s4403_s7 + $0x50] sm:$0xff]  ;;  %v1090_v61 = vsel %vm1089_vm0, %v3693_v57, 0.0  ;;  %v985_v6 = vld [vmem:[%s4403_s7 + $0x60] sm:$0xff]  ;;  %v3080_v10 = vpack.c.bf16 %v887_v4, %v886_v3  ;;  %v889_v14 = vld [vmem:[%s4402_s6 + $0x78] sm:$0xff]  ;;  %s791_s15 = scalar_lea.vmem %s4409_s13, %s3637_s28 }
  0x3a   : > { %3096 = vmatpush1.bf16.msra.mxu1 %v3095_v33  ;;  %v3677_v52 = vld [vmem:[%s781_s21] sm:$0xff]  ;;  %v3687_v56 = vld [vmem:[%s781_s21 + $0x8] sm:$0xff]  ;;  %s3706_s21 = scalar_lea.vmem [#allocation6], %s3635_s18  ;;  %2676 = vmatprep.mubr.msk.f32.mxu1 %vm997_vm1, %v871_v54  ;;  %v3104_v2 = vpack.c.bf16 %v984_v59, %v983_v58  ;;  %v3107_v12 = vpack.c.bf16 %v986_v7, %v985_v6  ;;  %v888_v13 = vld [vmem:[%s4402_s6 + $0x70] sm:$0xff]  ;;  %s4421_s18 = sld [smem:[#allocation9_spill]] }
  0x3b   : > { %3097 = vmatprep.subr.bf16.mxu1 %v3434_v17  ;;  %v3709_v62 = vld [vmem:[%s3706_s21] sm:$0xff]  ;;  %v855_v0 = vmul.f32 %v854_v60, %v3677_v52  ;;  %v856_v1 = vmul.f32 %v854_v60, %v3687_v56  ;;  %1091 = vadd.xlane.f32.xlu1 %v1090_v61  ;;  %v3733_v9 = vld [vmem:[%s3706_s21 + $0x8] sm:$0xff]  ;;  %v3084_v20 = vpack.c.bf16 %v889_v14, %v888_v13  ;;  %v989_v23 = vld [vmem:[%s4403_s7 + $0x80] sm:$0xff] }
  0x3c   : > { %3067 = vmatpush3.bf16.msra.mxu0 %v3064_v32  ;;  %v1107_v5 = vsel %vm1106_vm2, %v3709_v62, 0.0  ;;  %v1088_v15 = vld [vmem:[%s3690_s25 + $0x8] sm:$0xff]  ;;  %v1110_v16 = vsel %vm1106_vm2, %v3733_v9, 0.0  ;;  %v987_v18 = vld [vmem:[%s4403_s7 + $0x70] sm:$0xff]  ;;  %v990_v24 = vld [vmem:[%s4403_s7 + $0x88] sm:$0xff] }
  0x3d   : > { %3069 = vmatprep.subr.bf16.mxu0 %v3068_v39  ;;  %v858_v8 = vsel %vm857_vm3, %v855_v0, 0.0  ;;  %v861_v11 = vsel %vm857_vm3, %v856_v1, 0.0  ;;  %v988_v19 = vld [vmem:[%s4403_s7 + $0x78] sm:$0xff]  ;;  %v1093_v21 = vsel %vm1089_vm0, %v1088_v15, 0.0  ;;  %v3113_v25 = vpack.c.bf16 %v990_v24, %v989_v23  ;;  %v991_v26 = vld [vmem:[%s4403_s7 + $0x90] sm:$0xff]  ;;  %v993_v30 = vld [vmem:[%s4403_s7 + $0xa0] sm:$0xff] }
  0x3e   : > { %3099 = vmatpush1.bf16.msra.mxu1 %v3098_v40  ;;  %859 = vadd.xlane.f32.xlu0 %v858_v8  ;;  %v3110_v22 = vpack.c.bf16 %v988_v19, %v987_v18  ;;  %v992_v27 = vld [vmem:[%s4403_s7 + $0x98] sm:$0xff]  ;;  %v994_v31 = vld [vmem:[%s4403_s7 + $0xa8] sm:$0xff]  ;;  %v995_v33 = vld [vmem:[%s4403_s7 + $0xb0] sm:$0xff] }
  0x3f   : > { %3100 = vmatprep.subr.bf16.mxu1 %v3434_v17  ;;  %1108 = vadd.xlane.f32.xlu1 %v1107_v5  ;;  %v3116_v29 = vpack.c.bf16 %v992_v27, %v991_v26  ;;  %v3119_v32 = vpack.c.bf16 %v994_v31, %v993_v30  ;;  %v996_v34 = vld [vmem:[%s4403_s7 + $0xb8] sm:$0xff]  ;;  %v1522_v51 = vld [vmem:[%s4408_s12 + $0x10] sm:$0xff] }
  0x40   : > { %3071 = vmatpush3.bf16.msra.mxu0 %v3068_v39  ;;  %v3122_v35 = vpack.c.bf16 %v996_v34, %v995_v33  ;;  %v3786_v36 = vld [vmem:[%s3672_s16 + $0x8] sm:$0xff]  ;;  %s803_s26 = scalar_lea.vmem %s4421_s18, %s3637_s28 }
  0x41   : > { %3073 = vmatprep.subr.bf16.mxu0 %v3072_v49  ;;  %v873_v39 = vunpack.c.h.bf16 %v3786_v36  ;;  %v872_v40 = vunpack.c.l.bf16 %v3786_v36  ;;  %v2697_v36 = vld [vmem:[%s4402_s6 + $0x80] sm:$0xff] }
  0x42   : > { %3102 = vmatpush1.bf16.msra.mxu1 %v3101_v53  ;;  %862 = vadd.xlane.f32.xlu0 %v861_v11 }
  0x43   : > { %3103 = vmatprep.subr.bf16.mxu1 %v3434_v17  ;;  %1111 = vadd.xlane.f32.xlu1 %v1110_v16 }
  0x44   : > { %3075 = vmatpush3.bf16.msra.mxu0 %v3072_v49 }
  0x45   : > { %3077 = vmatprep.subr.bf16.mxu0 %v3076_v63 }
  0x46   : > { %3105 = vmatpush1.bf16.msra.mxu1 %v3104_v2  ;;  %1094 = vadd.xlane.f32.xlu0 %v1093_v21 }
  0x47   : > { %3106 = vmatprep.subr.bf16.mxu1 %v3434_v17 }
  0x48   : > { %3079 = vmatpush3.bf16.msra.mxu0 %v3076_v63 }
  0x49   : > { %3081 = vmatprep.subr.bf16.mxu0 %v3080_v10 }
  0x4a   : > { %3108 = vmatpush1.bf16.msra.mxu1 %v3107_v12 }
  0x4b   : > { %3109 = vmatprep.subr.bf16.mxu1 %v3434_v17 }
  0x4c   : > { %3083 = vmatpush3.bf16.msra.mxu0 %v3080_v10 }
  0x4d   : > { %3085 = vmatprep.subr.bf16.mxu0 %v3084_v20 }
  0x4e   : > { %3111 = vmatpush1.bf16.msra.mxu1 %v3110_v22  ;;  %v3808_v22 = vld [vmem:[%s4404_s8] sm:$0xf] }
  0x4f   : > { %3112 = vmatprep.subr.bf16.mxu1 %v3434_v17 }
  0x50   : > { %3087 = vmatpush3.bf16.msra.mxu0 %v3084_v20 }
  0x52   : > { %3114 = vmatpush1.bf16.msra.mxu1 %v3113_v25 }
  0x53   : > { %3115 = vmatprep.subr.bf16.mxu1 %v3434_v17  ;;  %2905 = vmatmul.mubr.f32.vlgmr.msra.gmra.mrb[0].mxu0 %v2768_v28 }
  0x56   : > { %3117 = vmatpush1.bf16.msra.mxu1 %v3116_v29 }
  0x57   : > { %3118 = vmatprep.subr.bf16.mxu1 %v3434_v17 }
  0x5a   : > { %3120 = vmatpush1.bf16.msra.mxu1 %v3119_v32 }
  0x5b   : > { %3121 = vmatprep.subr.bf16.mxu1 %v3434_v17 }
  0x5e   : > { %3123 = vmatpush1.bf16.msra.mxu1 %v3122_v35 }
  0x61   : > { %1069 = vmatmul.mubr.f32.vlgmr.msra.gmra.mrb[0].mxu1 %v870_v37 }
  0x62   : > { %2677 = vmatprep.mubr.msk.f32.mxu1 %vm997_vm1, %v873_v39 }
  0x65   : > { %1074 = vmatmul.mubr.f32.gmra.mrb[2].mxu1 %v872_v40 }
  0xc8   : > { %v1092_v43 = vpop.xlane.xlu1 %1091 }
  0xc9   : > { %vm1096_vm4 = vcmp.eq.f32.partialorder %v1092_v43, 0.0 }
  0xca   : > { %v1102_v50 = vsel %vm1096_vm4, 1.0, %v3693_v57  ;;  %vm1173_vm4 = vcmask 1043456  }
  0xcb   : > { %v860_v41 = vpop.xlane.xlu0 %859  ;;  %vm1121_vm7 = vcmp.gt.f32.partialorder %v1102_v50, 0.0  ;;  %2907 = vmatprep.subr.msk.mxu1 %vm1173_vm4, %v3808_v22 }
  0xcc   : > { %v1109_v0 = vpop.xlane.xlu1 %1108  ;;  %2908 = vmatpush3.msk.msra.mxu1 %vm1173_vm4, %v3808_v22 }
  0xcd   : > { %vm1113_vm10 = vcmp.eq.f32.partialorder %v1109_v0, 0.0  ;;  %v829_v0 = vld [vmem:[%s4407_s11 + $0x10] sm:$0xff] }
  0xce   : > { %v1119_v6 = vsel %vm1113_vm10, 1.0, %v3709_v62 }
  0xcf   : > { %v863_v42 = vpop.xlane.xlu0 %862  ;;  %vm1125_vm12 = vcmp.gt.f32.partialorder %v1119_v6, 0.0  ;;  %v813_v6 = vld [vmem:[%s4406_s10 + $0x10] sm:$0xff] }
  0xd0   : > { %v1112_v57 = vpop.xlane.xlu1 %1111 }
  0xd1   : > { %vm1114_vm11 = vcmp.eq.f32.partialorder %v1112_v57, 0.0 }
  0xd2   : > { %v1120_v12 = vsel %vm1114_vm11, 1.0, %v3733_v9  ;;  %v3817_v9 = vld [vmem:[%s4405_s9 + $0x8] sm:$0x3f] }
  0xd3   : > { %v1095_v44 = vpop.xlane.xlu0 %1094  ;;  %vm1126_vm14 = vcmp.gt.f32.partialorder %v1120_v12, 0.0  ;;  %v815_v12 = vld [vmem:[%s4406_s10 + $0x20] sm:$0xff] }
  0xd4   : > { %vm1097_vm5 = vcmp.eq.f32.partialorder %v1095_v44, 0.0 }
  0xd5   : > { %v1103_v53 = vsel %vm1097_vm5, 1.0, %v1088_v15  ;;  %vm1335_vm5 = vcmask 1045504  }
  0xd6   : > { %vm1122_vm8 = vcmp.gt.f32.partialorder %v1103_v53, 0.0  ;;  %2681 = vmatprep.subr.msk.mxu1 %vm1335_vm5, %v3817_v9 }
 0x126   : > { %v2906_v46 = vpop.f32.mrb[0].mxu0 }
 0x127   : > { %v956_v47 = vpop.f32.mrb[1].mxu0  ;;  %v966_v49 = vadd.f32 %v2906_v46, %v863_v42 }
 0x128   : > { %v965_v58 = vadd.f32 %v956_v47, %v860_v41 }
 0x129   : > { %v970_v59 = vmul.f32 0.2, %v966_v49  ;;  %vm968_vm6 = vcmp.gt.f32.partialorder %v966_v49, 0.0 }
 0x12a   : > { %v969_v60 = vmul.f32 0.2, %v965_v58  ;;  %vm967_vm9 = vcmp.gt.f32.partialorder %v965_v58, 0.0 }
 0x12b   : > { %v972_v61 = vsel %vm968_vm6, %v966_v49, %v970_v59  ;;  %v3826_v49 = vld [vmem:[%s4405_s9] sm:$0x3f]  ;;  %v3435_v59 = vmov 0.0  }
 0x12c   : > { %v971_v63 = vsel %vm967_vm9, %v965_v58, %v969_v60  ;;  %v1124_v2 = vsel %vm1122_vm8, %v972_v61, -1e+30  ;;  %v827_v61 = vld [vmem:[%s4407_s11] sm:$0xff] }
 0x12d   : > { %v1123_v1 = vsel %vm1121_vm7, %v971_v63, -1e+30  ;;  %v1132_v4 = vsel %vm1089_vm0, %v1124_v2, -inf  ;;  %v828_v63 = vld [vmem:[%s4407_s11 + $0x8] sm:$0xff] }
 0x12e   : > { %v1129_v3 = vsel %vm1089_vm0, %v1123_v1, -inf }
 0x12f   : > { %1130 = vmax.xlane.f32.xlu0 %v1129_v3  ;;  %v811_v3 = vld [vmem:[%s4406_s10] sm:$0xff] }
 0x133   : > { %1133 = vmax.xlane.f32.xlu0 %v1132_v4  ;;  %v812_v4 = vld [vmem:[%s4406_s10 + $0x8] sm:$0xff] }
 0x134   : > { %v1070_v5 = vpop.f32.mrb[0].mxu1 }
 0x135   : > { %v1079_v7 = vadd.f32 %v1070_v5, %v860_v41  ;;  %v1072_v8 = vpop.f32.mrb[1].mxu1  ;;  %v3862_v5 = vpack.c.bf16 %v812_v4, %v811_v3  ;;  %v825_v4 = vld [vmem:[%s4406_s10 + $0x70] sm:$0xff] }
 0x136   : > { %v831_v8 = vld [vmem:[%s4407_s11 + $0x20] sm:$0xff] }
 0x137   : > { %v1083_v10 = vmul.f32 0.2, %v1079_v7  ;;  %vm1081_vm13 = vcmp.gt.f32.partialorder %v1079_v7, 0.0  ;;  %3125 = vmatprep.subr.bf16.mxu0 %v3862_v5 }
 0x138   : > { %v1075_v11 = vpop.f32.mrb[2].mxu1  ;;  %3127 = vmatpush3.bf16.msra.mxu0 %v3862_v5 }
 0x139   : > { %v1080_v13 = vadd.f32 %v1075_v11, %v863_v42  ;;  %v1077_v14 = vpop.f32.mrb[3].mxu1  ;;  %v1085_v15 = vsel %vm1081_vm13, %v1079_v7, %v1083_v10  ;;  %v814_v7 = vld [vmem:[%s4406_s10 + $0x18] sm:$0xff]  ;;  %v832_v10 = vld [vmem:[%s4407_s11 + $0x28] sm:$0xff] }
 0x13a   : > { %v1127_v16 = vsel %vm1125_vm12, %v1085_v15, -1e+30  ;;  %v3877_v11 = vpack.c.bf16 %v814_v7, %v813_v6  ;;  %v3888_v14 = vpack.c.bf16 %v832_v10, %v831_v8  ;;  %v833_v15 = vld [vmem:[%s4407_s11 + $0x30] sm:$0xff]  ;;  %v826_v6 = vld [vmem:[%s4406_s10 + $0x78] sm:$0xff]  ;;  %v847_v8 = vld [vmem:[%s4407_s11 + $0xa0] sm:$0xff] }
 0x13b   : > { %v1084_v18 = vmul.f32 0.2, %v1080_v13  ;;  %v1135_v19 = vsel %vm1106_vm2, %v1127_v16, -inf  ;;  %vm1082_vm15 = vcmp.gt.f32.partialorder %v1080_v13, 0.0  ;;  %v4015_v7 = vpack.c.bf16 %v826_v6, %v825_v4  ;;  %v848_v10 = vld [vmem:[%s4407_s11 + $0xa8] sm:$0xff]  ;;  %v2705_v6 = vld [vmem:[%s4402_s6 + $0xc0] sm:$0xff] }
 0x13c   : > { %1136 = vmax.xlane.f32.xlu1 %v1135_v19  ;;  %3129 = vmatprep.subr.bf16.mxu0 %v3877_v11  ;;  %v817_v19 = vld [vmem:[%s4406_s10 + $0x30] sm:$0xff] }
 0x13d   : > { %v1086_v62 = vsel %vm1082_vm15, %v1080_v13, %v1084_v18  ;;  %v816_v13 = vld [vmem:[%s4406_s10 + $0x28] sm:$0xff]  ;;  %v834_v18 = vld [vmem:[%s4407_s11 + $0x38] sm:$0xff]  ;;  %3131 = vmatpush3.bf16.msra.mxu0 %v3877_v11 }
 0x13e   : > { %v1128_v20 = vsel %vm1126_vm14, %v1086_v62, -1e+30  ;;  %v818_v62 = vld [vmem:[%s4406_s10 + $0x38] sm:$0xff] }
 0x13f   : > { %v1138_v21 = vsel %vm1106_vm2, %v1128_v20, -inf }
 0x140   : > { %1139 = vmax.xlane.f32.xlu1 %v1138_v21  ;;  %v835_v21 = vld [vmem:[%s4407_s11 + $0x40] sm:$0xff] }
 0x1bc   : > { %v1131_v23 = vpop.xlane.xlu0 %1130 }
 0x1c0   : > { %v1134_v29 = vpop.xlane.xlu0 %1133 }
 0x1c9   : > { %v1137_v24 = vpop.xlane.xlu1 %1136 }
 0x1ca   : > { %v1141_v25 = vmax.f32 %v1131_v23, %v1137_v24  ;;  %v3914_v23 = vpack.c.bf16 %v818_v62, %v817_v19  ;;  %v836_v24 = vld [vmem:[%s4407_s11 + $0x48] sm:$0xff]  ;;  %v1520_v19 = vld [vmem:[%s4408_s12] sm:$0xff] }
 0x1cb   : > { %v1521_v62 = vld [vmem:[%s4408_s12 + $0x8] sm:$0xff] }
 0x1cc   : > { %v1143_v26 = vsub.f32 %v1123_v1, %v1141_v25  ;;  %v1149_v27 = vsub.f32 %v1127_v16, %v1141_v25  ;;  %v3848_v1 = vpack.c.bf16 %v828_v63, %v827_v61  ;;  %v3894_v16 = vpack.c.bf16 %v816_v13, %v815_v12  ;;  %v819_v25 = vld [vmem:[%s4406_s10 + $0x40] sm:$0xff]  ;;  %v844_v61 = vld [vmem:[%s4407_s11 + $0x88] sm:$0xff]  ;;  %v849_v13 = vld [vmem:[%s4407_s11 + $0xb0] sm:$0xff] }
 0x1cd   : > { %v1140_v30 = vpop.xlane.xlu1 %1139  ;;  %v4023_v12 = vpack.c.bf16 %v848_v10, %v847_v8  ;;  %v2706_v8 = vld [vmem:[%s4402_s6 + $0xc8] sm:$0xff] }
 0x1ce   : > { %v1145_v31 = vmul.f32 1.442695, %v1143_v26  ;;  %v1151_v32 = vmul.f32 1.442695, %v1149_v27  ;;  %v1142_v33 = vmax.f32 %v1134_v29, %v1140_v30  ;;  %3133 = vmatprep.subr.bf16.mxu0 %v3894_v16  ;;  %v820_v26 = vld [vmem:[%s4406_s10 + $0x48] sm:$0xff]  ;;  %v3928_v27 = vpack.c.bf16 %v836_v24, %v835_v21  ;;  %v837_v29 = vld [vmem:[%s4407_s11 + $0x50] sm:$0xff] }
 0x1cf   : > { %3135 = vmatpush3.bf16.msra.mxu0 %v3894_v16  ;;  %v3934_v30 = vpack.c.bf16 %v820_v26, %v819_v25  ;;  %v3192_v21 = vpack.c.bf16 %v1521_v62, %v1520_v19  ;;  %v3216_v10 = vpack.c.bf16 %v2706_v8, %v2705_v6  ;;  %v2709_v62 = vld [vmem:[%s4402_s6 + $0xe0] sm:$0xff] }
 0x1d0   : > { %3370 = vpow2.f32 %v1145_v31  ;;  %v1144_v34 = vsub.f32 %v1124_v2, %v1142_v33  ;;  %v1150_v35 = vsub.f32 %v1128_v20, %v1142_v33  ;;  %v830_v2 = vld [vmem:[%s4407_s11 + $0x18] sm:$0xff]  ;;  %v3908_v20 = vpack.c.bf16 %v834_v18, %v833_v15  ;;  %3137 = vmatprep.subr.bf16.mxu0 %v3914_v23 }
 0x1d1   : > { %3372 = vpow2.f32 %v1151_v32  ;;  %v3860_v57 = vpack.c.bf16 %v830_v2, %v829_v0  ;;  %v838_v31 = vld [vmem:[%s4407_s11 + $0x58] sm:$0xff]  ;;  %v821_v32 = vld [vmem:[%s4406_s10 + $0x50] sm:$0xff] }
 0x1d2   : > { %v1147_v41 = vmul.f32 1.442695, %v1144_v34  ;;  %v1153_v42 = vmul.f32 1.442695, %v1150_v35  ;;  %v822_v33 = vld [vmem:[%s4406_s10 + $0x58] sm:$0xff]  ;;  %v3948_v34 = vpack.c.bf16 %v838_v31, %v837_v29  ;;  %v839_v35 = vld [vmem:[%s4407_s11 + $0x60] sm:$0xff] }
 0x1d3   : > { %3139 = vmatpush3.bf16.msra.mxu0 %v3914_v23  ;;  %v845_v0 = vld [vmem:[%s4407_s11 + $0x90] sm:$0xff]  ;;  %v846_v2 = vld [vmem:[%s4407_s11 + $0x98] sm:$0xff] }
 0x1d4   : > { %3374 = vpow2.f32 %v1147_v41  ;;  %3141 = vmatprep.subr.bf16.mxu0 %v3934_v30  ;;  %v3954_v41 = vpack.c.bf16 %v822_v33, %v821_v32  ;;  %v4004_v3 = vpack.c.bf16 %v846_v2, %v845_v0  ;;  %v850_v15 = vld [vmem:[%s4407_s11 + $0xb8] sm:$0xff]  ;;  %v2703_v0 = vld [vmem:[%s4402_s6 + $0xb0] sm:$0xff] }
 0x1d5   : > { %3376 = vpow2.f32 %v1153_v42  ;;  %v840_v42 = vld [vmem:[%s4407_s11 + $0x68] sm:$0xff]  ;;  %v4035_v18 = vpack.c.bf16 %v850_v15, %v849_v13  ;;  %v2704_v2 = vld [vmem:[%s4402_s6 + $0xb8] sm:$0xff]  ;;  %v2707_v13 = vld [vmem:[%s4402_s6 + $0xd0] sm:$0xff] }
 0x1d6   : > { %v3212_v4 = vpack.c.bf16 %v2704_v2, %v2703_v0  ;;  %v2708_v15 = vld [vmem:[%s4402_s6 + $0xd8] sm:$0xff] }
 0x1d7   : > { %3143 = vmatpush3.bf16.msra.mxu0 %v3934_v30  ;;  %v3220_v19 = vpack.c.bf16 %v2708_v15, %v2707_v13  ;;  %v2715_v15 = vld [vmem:[%s4403_s7 + $0xd0] sm:$0xff] }
 0x1d8   : > { %3145 = vmatprep.subr.bf16.mxu0 %v3954_v41 }
 0x1da   : > { %v3371_v43 = vpop.eup %3370 }
 0x1db   : > { %2909 = vmatprep.mubr.msk.f32.mxu1 %vm1089_vm0, %v3371_v43  ;;  %v1155_v44 = vsel %vm1089_vm0, %v3371_v43, 0.0  ;;  %v3373_v46 = vpop.eup %3372  ;;  %v823_v43 = vld [vmem:[%s4406_s10 + $0x60] sm:$0xff]  ;;  %3147 = vmatpush3.bf16.msra.mxu0 %v3954_v41 }
 0x1dc   : > { %1156 = vadd.xlane.f32.xlu0 %v1155_v44  ;;  %v1161_v50 = vsel %vm1106_vm2, %v3373_v46, 0.0  ;;  %v824_v44 = vld [vmem:[%s4406_s10 + $0x68] sm:$0xff] }
 0x1de   : > { %v3375_v47 = vpop.eup %3374 }
 0x1df   : > { %2910 = vmatmul.mubr.msk.f32.vlgmr.msra.gmra.mrb[4].mxu1 %vm1089_vm0, %v3375_v47  ;;  %v1158_v53 = vsel %vm1089_vm0, %v3375_v47, 0.0  ;;  %v3377_v58 = vpop.eup %3376  ;;  %v3971_v47 = vpack.c.bf16 %v824_v44, %v823_v43  ;;  %v2700_v44 = vld [vmem:[%s4402_s6 + $0x98] sm:$0xff] }
 0x1e0   : > { %1162 = vadd.xlane.f32.xlu0 %v1161_v50  ;;  %1159 = vadd.xlane.f32.xlu1 %v1158_v53  ;;  %v1164_v60 = vsel %vm1106_vm2, %v3377_v58, 0.0  ;;  %v841_v50 = vld [vmem:[%s4407_s11 + $0x70] sm:$0xff]  ;;  %v842_v53 = vld [vmem:[%s4407_s11 + $0x78] sm:$0xff] }
 0x1e1   : > { %2682 = vmatpush1.msk.msra.mxu1 %vm1335_vm5, %v3826_v49  ;;  %1406 = vmatprep.mubr.f32.mxu1 %v3435_v59 }
 0x1e2   : > { %3156 = vmatprep.subr.bf16.mxu1 %v3434_v17  ;;  %3149 = vmatprep.subr.bf16.mxu0 %v3971_v47 }
 0x1e3   : > { %2683 = vmatmul.mubr.msk.f32.vlgmr.msra.gmra.mrb[6].mxu1 %vm1106_vm2, %v3373_v46  ;;  %v3968_v46 = vpack.c.bf16 %v840_v42, %v839_v35  ;;  %3151 = vmatpush3.bf16.msra.mxu0 %v3971_v47 }
 0x1e4   : > { %1165 = vadd.xlane.f32.xlu1 %v1164_v60  ;;  %1412 = vmatprep.mubr.f32.mxu1 %v3435_v59  ;;  %v843_v60 = vld [vmem:[%s4407_s11 + $0x80] sm:$0xff] }
 0x1e5   : > { %3158 = vmatpush1.bf16.msra.mxu1 %v3848_v1  ;;  %v3994_v63 = vpack.c.bf16 %v844_v61, %v843_v60  ;;  %3153 = vmatprep.subr.bf16.mxu0 %v4015_v7  ;;  %v2702_v60 = vld [vmem:[%s4402_s6 + $0xa8] sm:$0xff] }
 0x1e6   : > { %3159 = vmatprep.subr.bf16.mxu1 %v3434_v17 }
 0x1e7   : > { %2684 = vmatmul.mubr.msk.f32.gmra.mrb[8].mxu1 %vm1106_vm2, %v3377_v58  ;;  %v3982_v58 = vpack.c.bf16 %v842_v53, %v841_v50  ;;  %3155 = vmatpush3.bf16.msra.mxu0 %v4015_v7  ;;  %v2701_v53 = vld [vmem:[%s4402_s6 + $0xa0] sm:$0xff] }
 0x1e8   : > { %v3208_v61 = vpack.c.bf16 %v2702_v60, %v2701_v53  ;;  %v2713_v60 = vld [vmem:[%s4403_s7 + $0xc0] sm:$0xff] }
 0x1e9   : > { %3161 = vmatpush1.bf16.msra.mxu1 %v3860_v57 }
 0x1ea   : > { %3162 = vmatprep.subr.bf16.mxu1 %v3434_v17 }
 0x1ed   : > { %3164 = vmatpush1.bf16.msra.mxu1 %v3888_v14 }
 0x1ee   : > { %3165 = vmatprep.subr.bf16.mxu1 %v3434_v17 }
 0x1f1   : > { %3167 = vmatpush1.bf16.msra.mxu1 %v3908_v20 }
 0x1f2   : > { %3168 = vmatprep.subr.bf16.mxu1 %v3434_v17 }
 0x1f5   : > { %3170 = vmatpush1.bf16.msra.mxu1 %v3928_v27 }
 0x1f6   : > { %3171 = vmatprep.subr.bf16.mxu1 %v3434_v17 }
 0x1f9   : > { %3173 = vmatpush1.bf16.msra.mxu1 %v3948_v34 }
 0x1fa   : > { %3174 = vmatprep.subr.bf16.mxu1 %v3434_v17 }
 0x1fd   : > { %3176 = vmatpush1.bf16.msra.mxu1 %v3968_v46 }
 0x1fe   : > { %3177 = vmatprep.subr.bf16.mxu1 %v3434_v17 }
 0x201   : > { %3179 = vmatpush1.bf16.msra.mxu1 %v3982_v58 }
 0x202   : > { %3180 = vmatprep.subr.bf16.mxu1 %v3434_v17 }
 0x205   : > { %3182 = vmatpush1.bf16.msra.mxu1 %v3994_v63 }
 0x206   : > { %3183 = vmatprep.subr.bf16.mxu1 %v3434_v17 }
 0x209   : > { %3185 = vmatpush1.bf16.msra.mxu1 %v4004_v3 }
 0x20a   : > { %3186 = vmatprep.subr.bf16.mxu1 %v3434_v17 }
 0x20d   : > { %3188 = vmatpush1.bf16.msra.mxu1 %v4023_v12 }
 0x20e   : > { %3189 = vmatprep.subr.bf16.mxu1 %v3434_v17 }
 0x211   : > { %3191 = vmatpush1.bf16.msra.mxu1 %v4035_v18 }
 0x212   : > { %3193 = vmatprep.subr.bf16.mxu1 %v3192_v21 }
 0x2b2   : > { %v2911_v24 = vpop.f32.mrb[4].mxu1 }
 0x2b3   : > { %v1243_v25 = vpop.f32.mrb[5].mxu1  ;;  %v1253_v29 = vmul.f32 %v2911_v24, %v2768_v28 }
 0x2b4   : > { %v1252_v26 = vmul.f32 %v2767_v48, %v1243_v25  ;;  %v4109_v25 = vld [vmem:[%s4420_s27 + $0x8] sm:$0xff]   ;;  %s797_s27 = scalar_lea.vmem %s4410_s14, %s3637_s28 }
 0x2b6   : > { %2944 = vmatprep.mubr.f32.mxu0 %v1252_v26  ;;  %v1408_v31 = vpop.f32.mrb[6].mxu1  ;;  %v2711_v26 = vld [vmem:[%s4402_s6 + $0xf0] sm:$0xff] }
 0x2b7   : > { %2945 = vmatmul.mubr.f32.vlgmr.msra.gmra.mrb[2].mxu0 %v1253_v29  ;;  %v1410_v32 = vpop.f32.mrb[7].mxu1  ;;  %v1419_v35 = vmul.f32 %v1408_v31, %v870_v37  ;;  %v2698_v37 = vld [vmem:[%s4402_s6 + $0x88] sm:$0xff]  ;;  %v2712_v29 = vld [vmem:[%s4402_s6 + $0xf8] sm:$0xff] }
 0x2b8   : > { %v1420_v33 = vmul.f32 %v1410_v32, %v871_v54  ;;  %v1523_v54 = vld [vmem:[%s4408_s12 + $0x18] sm:$0xff]  ;;  %v3228_v31 = vpack.c.bf16 %v2712_v29, %v2711_v26  ;;  %v2772_v32 = vunpack.c.h.bf16 %v4109_v25 }
 0x2b9   : > { %v3196_v28 = vpack.c.bf16 %v1523_v54, %v1522_v51  ;;  %v4136_v51 = vld [vmem:[%s3706_s21 + $0x10] sm:$0xff] }
 0x2ba   : > { %v1414_v42 = vpop.f32.mrb[8].mxu1  ;;  %2685 = vmatprep.mubr.msk.f32.mxu1 %vm997_vm1, %v1420_v33  ;;  %v2771_v33 = vunpack.c.l.bf16 %v4109_v25 }
 0x2bb   : > { %v1416_v43 = vpop.f32.mrb[9].mxu1  ;;  %1494 = vmatmul.mubr.f32.vlgmr.msra.gmra.mrb[10].mxu1 %v1419_v35  ;;  %v1421_v45 = vmul.f32 %v1414_v42, %v872_v40  ;;  %v2699_v40 = vld [vmem:[%s4402_s6 + $0x90] sm:$0xff]  ;;  %v1645_v35 = vsub.s32 1, %v3639_v38  ;;  %v1901_v38 = vsel %vm1106_vm2, %v4136_v51, 0.0 }
 0x2bc   : > { %v1422_v48 = vmul.f32 %v1416_v43, %v873_v39  ;;  %3195 = vmatpush3.bf16.msra.mxu1 %v3192_v21  ;;  %v3200_v39 = vpack.c.bf16 %v2698_v37, %v2697_v36  ;;  %v3204_v50 = vpack.c.bf16 %v2700_v44, %v2699_v40  ;;  %v2710_v21 = vld [vmem:[%s4402_s6 + $0xe8] sm:$0xff]  ;;  %2996 = vmatprep.mubr.f32.mxu0 %v2771_v33  ;;  %v1157_v37 = vpop.xlane.xlu0 %1156 }
 0x2bd   : > { %3197 = vmatprep.subr.bf16.mxu1 %v3196_v28  ;;  %v3224_v24 = vpack.c.bf16 %v2710_v21, %v2709_v62  ;;  %v1646_v42 = vrot.slane %v3685_v55, %v1645_v35  ;;  %v4145_v55 = vld [vmem:[%s3690_s25 + $0x18] sm:$0xff]  ;;  %3378 = vrcp.f32 %v1157_v37  ;;  %v2717_v35 = vld [vmem:[%s4403_s7 + $0xe0] sm:$0xff] }
 0x2be   : > { %2686 = vmatprep.mubr.msk.f32.mxu1 %vm997_vm1, %v1422_v48  ;;  %3201 = vmatprep.subr.bf16.mxu0 %v3200_v39 }
 0x2bf   : > { %1499 = vmatmul.mubr.f32.gmra.mrb[12].mxu1 %v1421_v45  ;;  %3203 = vmatpush3.bf16.msra.mxu0 %v3200_v39  ;;  %v1647_v43 = vmul.f32 %v1646_v42, %v3677_v52  ;;  %v1648_v48 = vmul.f32 %v1646_v42, %v3687_v56  ;;  %v4133_v45 = vld [vmem:[%s3690_s25 + $0x10] sm:$0xff]  ;;  %v4148_v52 = vld [vmem:[%s3706_s21 + $0x18] sm:$0xff]  ;;  %v1887_v56 = vsel %vm1089_vm0, %v4145_v55, 0.0  ;;  %v1160_v39 = vpop.xlane.xlu1 %1159 }
 0x2c0   : > { %3199 = vmatpush3.bf16.msra.mxu1 %v3196_v28  ;;  %3205 = vmatprep.subr.bf16.mxu0 %v3204_v50  ;;  %v1904_v36 = vsel %vm1106_vm2, %v4148_v52, 0.0  ;;  %v1163_v40 = vpop.xlane.xlu0 %1162  ;;  %3380 = vrcp.f32 %v1160_v39  ;;  %v2718_v42 = vld [vmem:[%s4403_s7 + $0xe8] sm:$0xff] }
 0x2c1   : > { %3232 = vmatprep.subr.bf16.mxu1 %v3434_v17  ;;  %v1649_v54 = vsel %vm857_vm3, %v1647_v43, 0.0  ;;  %v1652_v28 = vsel %vm857_vm3, %v1648_v48, 0.0  ;;  %3382 = vrcp.f32 %v1163_v40  ;;  %v1514_v44 = vadd.f32 %v1163_v40, %v1157_v37  ;;  %v2720_v40 = vld [vmem:[%s4403_s7 + $0xf8] sm:$0xff] }
 0x2c2   : > { %1650 = vadd.xlane.f32.xlu0 %v1649_v54  ;;  %1653 = vadd.xlane.f32.xlu1 %v1652_v28  ;;  %v3239_v37 = vpack.c.bf16 %v2718_v42, %v2717_v35  ;;  %v2732_v35 = vld [vmem:[%s4403_s7 + $0x158] sm:$0xff] }
 0x2c3   : > { %3207 = vmatpush3.bf16.msra.mxu0 %v3204_v50  ;;  %v1166_v50 = vpop.xlane.xlu1 %1165 }
 0x2c4   : > { %3209 = vmatprep.subr.bf16.mxu0 %v3208_v61  ;;  %3384 = vrcp.f32 %v1166_v50  ;;  %v1515_v53 = vadd.f32 %v1166_v50, %v1160_v39  ;;  %v2719_v39 = vld [vmem:[%s4403_s7 + $0xf0] sm:$0xff] }
 0x2c5   : > { %3386 = vrcp.f32 %v1514_v44 }
 0x2c6   : > { %1902 = vadd.xlane.f32.xlu1 %v1901_v38  ;;  %3388 = vrcp.f32 %v1515_v53 }
 0x2c7   : > { %3211 = vmatpush3.bf16.msra.mxu0 %v3208_v61  ;;  %v2714_v61 = vld [vmem:[%s4403_s7 + $0xc8] sm:$0xff]  ;;  %v3379_v2 = vpop.eup %3378 }
 0x2c8   : > { %3213 = vmatprep.subr.bf16.mxu0 %v3212_v4 }
 0x2ca   : > { %1905 = vadd.xlane.f32.xlu1 %v1904_v36  ;;  %v3381_v6 = vpop.eup %3380 }
 0x2cb   : > { %3215 = vmatpush3.bf16.msra.mxu0 %v3212_v4  ;;  %v3383_v62 = vpop.eup %3382 }
 0x2cc   : > { %3217 = vmatprep.subr.bf16.mxu0 %v3216_v10 }
 0x2ce   : > { %v3385_v43 = vpop.eup %3384 }
 0x2cf   : > { %3219 = vmatpush3.bf16.msra.mxu0 %v3216_v10  ;;  %v3233_v10 = vpack.c.bf16 %v2714_v61, %v2713_v60  ;;  %v3387_v54 = vpop.eup %3386  ;;  %v3242_v60 = vpack.c.bf16 %v2720_v40, %v2719_v39  ;;  %v2721_v61 = vld [vmem:[%s4403_s7 + $0x100] sm:$0xff] }
 0x2d0   : > { %3221 = vmatprep.subr.bf16.mxu0 %v3220_v19  ;;  %v3389_v44 = vpop.eup %3388 }
 0x2d3   : > { %3223 = vmatpush3.bf16.msra.mxu0 %v3220_v19  ;;  %v2716_v19 = vld [vmem:[%s4403_s7 + $0xd8] sm:$0xff] }
 0x2d4   : > { %3225 = vmatprep.subr.bf16.mxu0 %v3224_v24 }
 0x2d7   : > { %3227 = vmatpush3.bf16.msra.mxu0 %v3224_v24 }
 0x2d8   : > { %3229 = vmatprep.subr.bf16.mxu0 %v3228_v31 }
 0x2db   : > { %3231 = vmatpush3.bf16.msra.mxu0 %v3228_v31  ;;  %v3236_v31 = vpack.c.bf16 %v2716_v19, %v2715_v15  ;;  %v2727_v19 = vld [vmem:[%s4403_s7 + $0x130] sm:$0xff] }
 0x2dc   : > { %2999 = vmatprep.subr.msk.mxu0 %vm1173_vm4, %v3808_v22 }
 0x2de   : > { %2997 = vmatmul.mubr.f32.vlgmr.msra.gmra.mrb[4].mxu0 %v2772_v32 }
 0x2df   : > { %3000 = vmatpush3.msk.msra.mxu0 %vm1173_vm4, %v3808_v22  ;;  %v1884_v22 = vsel %vm1089_vm0, %v4133_v45, 0.0 }
 0x2e0   : > { %3269 = vmatprep.subr.bf16.mxu0 %v3862_v5  ;;  %1885 = vadd.xlane.f32.xlu0 %v1884_v22 }
 0x2e4   : > { %1888 = vadd.xlane.f32.xlu0 %v1887_v56  ;;  %v4177_v56 = vld [vmem:[%s3672_s16 + $0x10] sm:$0xff] }
 0x2e5   : > { %v1664_v50 = vunpack.c.h.bf16 %v4177_v56 }
 0x38a   : > { %v2946_v0 = vpop.f32.mrb[2].mxu0 }
 0x38b   : > { %v1320_v4 = vpop.f32.mrb[3].mxu0  ;;  %v1507_v13 = vmul.f32 %v3381_v6, %v2946_v0  ;;  %v2724_v6 = vld [vmem:[%s4403_s7 + $0x118] sm:$0xff] }
 0x38c   : > { %v1506_v8 = vmul.f32 %v3379_v2, %v1320_v4 }
 0x38e   : > { %v1495_v21 = vpop.f32.mrb[10].mxu1  ;;  %2955 = vmatprep.mubr.msk.f32.mxu1 %vm857_vm3, %v1506_v8 }
 0x38f   : > { %v1510_v24 = vmul.f32 %v3383_v62, %v1495_v21  ;;  %v1512_v26 = vadd.f32 %v1495_v21, %v1320_v4  ;;  %v1497_v29 = vpop.f32.mrb[11].mxu1  ;;  %2956 = vmatmul.mubr.msk.f32.vlgmr.msra.gmra.mrb[14].mxu1 %vm857_vm3, %v1507_v13  ;;  %v2723_v4 = vld [vmem:[%s4403_s7 + $0x110] sm:$0xff]  ;;  %v2726_v13 = vld [vmem:[%s4403_s7 + $0x128] sm:$0xff]  ;;  %v2728_v62 = vld [vmem:[%s4403_s7 + $0x138] sm:$0xff] }
 0x390   : > { %3234 = vmatpush1.bf16.msra.mxu1 %v3233_v10  ;;  %v3248_v8 = vpack.c.bf16 %v2724_v6, %v2723_v4  ;;  %v2725_v10 = vld [vmem:[%s4403_s7 + $0x120] sm:$0xff]  ;;  %v3254_v21 = vpack.c.bf16 %v2728_v62, %v2727_v19 }
 0x391   : > { %2958 = vmatprep.mubr.msk.f32.mxu1 %vm857_vm3, %v1510_v24  ;;  %3235 = vmatprep.subr.bf16.mxu1 %v3434_v17  ;;  %v1518_v36 = vmul.f32 %v3387_v54, %v1512_v26  ;;  %v3251_v15 = vpack.c.bf16 %v2726_v13, %v2725_v10  ;;  %v2729_v24 = vld [vmem:[%s4403_s7 + $0x140] sm:$0xff]  ;;  %v2730_v26 = vld [vmem:[%s4403_s7 + $0x148] sm:$0xff] }
 0x392   : > { %v1500_v48 = vpop.f32.mrb[12].mxu1  ;;  %v3257_v29 = vpack.c.bf16 %v2730_v26, %v2729_v24 }
 0x393   : > { %v1511_v28 = vmul.f32 %v3385_v43, %v1500_v48  ;;  %v1513_v22 = vadd.f32 %v2946_v0, %v1500_v48  ;;  %v1502_v38 = vpop.f32.mrb[13].mxu1  ;;  %v2722_v0 = vld [vmem:[%s4403_s7 + $0x108] sm:$0xff]  ;;  %v2733_v43 = vld [vmem:[%s4403_s7 + $0x160] sm:$0xff] }
 0x394   : > { %3237 = vmatpush1.bf16.msra.mxu1 %v3236_v31  ;;  %v3245_v2 = vpack.c.bf16 %v2722_v0, %v2721_v61  ;;  %v2731_v31 = vld [vmem:[%s4403_s7 + $0x150] sm:$0xff]  ;;  %v2734_v48 = vld [vmem:[%s4403_s7 + $0x168] sm:$0xff] }
 0x395   : > { %2959 = vmatmul.mubr.msk.f32.gmra.mrb[16].mxu1 %vm857_vm3, %v1511_v28  ;;  %3238 = vmatprep.subr.bf16.mxu1 %v3434_v17  ;;  %v1519_v53 = vmul.f32 %v3389_v44, %v1513_v22  ;;  %v3260_v42 = vpack.c.bf16 %v2732_v35, %v2731_v31  ;;  %v3263_v54 = vpack.c.bf16 %v2734_v48, %v2733_v43  ;;  %v2735_v28 = vld [vmem:[%s4403_s7 + $0x170] sm:$0xff]  ;;  %v2736_v22 = vld [vmem:[%s4403_s7 + $0x178] sm:$0xff]  ;;  %v1651_v44 = vpop.xlane.xlu0 %1650 }
 0x396   : > { %2961 = vmatprep.mubr.msk.f32.mxu1 %vm857_vm3, %v1518_v36  ;;  %v3266_v38 = vpack.c.bf16 %v2736_v22, %v2735_v28  ;;  %v4251_v36 = vld [vmem:[%s3672_s16 + $0x18] sm:$0xff] }
 0x397   : > { %v1666_v39 = vunpack.c.h.bf16 %v4251_v36  ;;  %v1665_v40 = vunpack.c.l.bf16 %v4251_v36 }
 0x398   : > { %3240 = vmatpush1.bf16.msra.mxu1 %v3239_v37  ;;  %v1663_v37 = vunpack.c.l.bf16 %v4177_v56 }
 0x399   : > { %2962 = vmatmul.mubr.msk.f32.gmra.mrb[18].mxu1 %vm857_vm3, %v1519_v53  ;;  %3241 = vmatprep.subr.bf16.mxu1 %v3434_v17  ;;  %v1886_v53 = vpop.xlane.xlu0 %1885 }
 0x39a   : > { %2737 = vmatprep.mubr.msk.f32.mxu1 %vm997_vm1, %v1664_v50  ;;  %vm1890_vm6 = vcmp.eq.f32.partialorder %v1886_v53, 0.0 }
 0x39b   : > { %v1896_v4 = vsel %vm1890_vm6, 1.0, %v4133_v45 }
 0x39c   : > { %3243 = vmatpush1.bf16.msra.mxu1 %v3242_v60  ;;  %v1654_v60 = vpop.xlane.xlu1 %1653  ;;  %vm1915_vm8 = vcmp.gt.f32.partialorder %v1896_v4, 0.0 }
 0x39d   : > { %3244 = vmatprep.subr.bf16.mxu1 %v3434_v17  ;;  %v1889_v61 = vpop.xlane.xlu0 %1888 }
 0x39e   : > { %vm1891_vm7 = vcmp.eq.f32.partialorder %v1889_v61, 0.0 }
 0x39f   : > { %v1897_v13 = vsel %vm1891_vm7, 1.0, %v4145_v55 }
 0x3a0   : > { %3246 = vmatpush1.bf16.msra.mxu1 %v3245_v2  ;;  %vm1916_vm10 = vcmp.gt.f32.partialorder %v1897_v13, 0.0  ;;  %v1903_v48 = vpop.xlane.xlu1 %1902 }
 0x3a1   : > { %3247 = vmatprep.subr.bf16.mxu1 %v3434_v17  ;;  %vm1907_vm12 = vcmp.eq.f32.partialorder %v1903_v48, 0.0 }
 0x3a2   : > { %v1913_v22 = vsel %vm1907_vm12, 1.0, %v4136_v51 }
 0x3a3   : > { %vm1919_vm14 = vcmp.gt.f32.partialorder %v1913_v22, 0.0 }
 0x3a4   : > { %3249 = vmatpush1.bf16.msra.mxu1 %v3248_v8 }
 0x3a5   : > { %3250 = vmatprep.subr.bf16.mxu1 %v3434_v17 }
 0x3a8   : > { %3252 = vmatpush1.bf16.msra.mxu1 %v3251_v15 }
 0x3a9   : > { %3253 = vmatprep.subr.bf16.mxu1 %v3434_v17 }
 0x3ac   : > { %3255 = vmatpush1.bf16.msra.mxu1 %v3254_v21 }
 0x3ad   : > { %3256 = vmatprep.subr.bf16.mxu1 %v3434_v17 }
 0x3b0   : > { %3258 = vmatpush1.bf16.msra.mxu1 %v3257_v29 }
 0x3b1   : > { %3259 = vmatprep.subr.bf16.mxu1 %v3434_v17  ;;  %v2998_v0 = vpop.f32.mrb[4].mxu0 }
 0x3b2   : > { %v1750_v2 = vpop.f32.mrb[5].mxu0  ;;  %v1760_v8 = vadd.f32 %v2998_v0, %v1654_v60 }
 0x3b3   : > { %v1759_v6 = vadd.f32 %v1750_v2, %v1651_v44 }
 0x3b4   : > { %3261 = vmatpush1.bf16.msra.mxu1 %v3260_v42  ;;  %v1764_v15 = vmul.f32 0.2, %v1760_v8  ;;  %vm1762_vm11 = vcmp.gt.f32.partialorder %v1760_v8, 0.0 }
 0x3b5   : > { %3262 = vmatprep.subr.bf16.mxu1 %v3434_v17  ;;  %v1763_v10 = vmul.f32 0.2, %v1759_v6  ;;  %vm1761_vm9 = vcmp.gt.f32.partialorder %v1759_v6, 0.0 }
 0x3b6   : > { %v1766_v24 = vsel %vm1762_vm11, %v1760_v8, %v1764_v15 }
 0x3b7   : > { %v1765_v19 = vsel %vm1761_vm9, %v1759_v6, %v1763_v10  ;;  %v1918_v26 = vsel %vm1916_vm10, %v1766_v24, -1e+30 }
 0x3b8   : > { %3264 = vmatpush1.bf16.msra.mxu1 %v3263_v54  ;;  %v1917_v62 = vsel %vm1915_vm8, %v1765_v19, -1e+30  ;;  %v1926_v45 = vsel %vm1089_vm0, %v1918_v26, -inf  ;;  %v1906_v54 = vpop.xlane.xlu1 %1905 }
 0x3b9   : > { %3265 = vmatprep.subr.bf16.mxu1 %v3434_v17  ;;  %v1923_v21 = vsel %vm1089_vm0, %v1917_v62, -inf  ;;  %vm1908_vm13 = vcmp.eq.f32.partialorder %v1906_v54, 0.0 }
 0x3ba   : > { %1924 = vmax.xlane.f32.xlu0 %v1923_v21  ;;  %v1914_v2 = vsel %vm1908_vm13, 1.0, %v4148_v52 }
 0x3bb   : > { %vm1920_vm4 = vcmp.gt.f32.partialorder %v1914_v2, 0.0 }
 0x3bc   : > { %3267 = vmatpush1.bf16.msra.mxu1 %v3266_v38 }
 0x3be   : > { %1927 = vmax.xlane.f32.xlu0 %v1926_v45 }
 0x3bf   : > { %1863 = vmatmul.mubr.f32.vlgmr.msra.gmra.mrb[20].mxu1 %v1663_v37 }
 0x3c0   : > { %2738 = vmatprep.mubr.msk.f32.mxu1 %vm997_vm1, %v1666_v39 }
 0x3c3   : > { %1868 = vmatmul.mubr.f32.gmra.mrb[22].mxu1 %v1665_v40 }
 0x447   : > { %v1925_v21 = vpop.xlane.xlu0 %1924 }
 0x462   : > { %v2957_v29 = vpop.f32.mrb[14].mxu1 }
 0x463   : > { %1638 = vst.msk [vmem:[#allocation2 + $0x8] sm:$0xff] %vm857_vm3, %v2957_v29  ;;  %v1608_v31 = vpop.f32.mrb[15].mxu1 }
 0x464   : > { %1637 = vst.msk [vmem:[#allocation2] sm:$0xff] %vm857_vm3, %v1608_v31 }
 0x468   : > { %v2960_v55 = vpop.f32.mrb[16].mxu1 }
 0x469   : > { %1640 = vst.msk [vmem:[#allocation2 + $0x18] sm:$0xff] %vm857_vm3, %v2960_v55  ;;  %v1618_v35 = vpop.f32.mrb[17].mxu1 }
 0x46a   : > { %1639 = vst.msk [vmem:[#allocation2 + $0x10] sm:$0xff] %vm857_vm3, %v1618_v35 }
 0x46c   : > { %v2963_v42 = vpop.f32.mrb[18].mxu1 }
 0x46d   : > { %1642 = vst.msk [vmem:[#allocation2 + $0x28] sm:$0xff] %vm857_vm3, %v2963_v42  ;;  %v1628_v43 = vpop.f32.mrb[19].mxu1 }
 0x46e   : > { %1641 = vst.msk [vmem:[#allocation2 + $0x20] sm:$0xff] %vm857_vm3, %v1628_v43 }
 0x492   : > { %v1864_v28 = vpop.f32.mrb[20].mxu1 }
 0x493   : > { %v1873_v38 = vadd.f32 %v1864_v28, %v1651_v44  ;;  %v1866_v53 = vpop.f32.mrb[21].mxu1 }
 0x495   : > { %v1877_v61 = vmul.f32 0.2, %v1873_v38  ;;  %vm1875_vm15 = vcmp.gt.f32.partialorder %v1873_v38, 0.0 }
 0x496   : > { %v1869_v0 = vpop.f32.mrb[22].mxu1 }
 0x497   : > { %v1874_v4 = vadd.f32 %v1869_v0, %v1654_v60  ;;  %v1871_v6 = vpop.f32.mrb[23].mxu1  ;;  %v1879_v8 = vsel %vm1875_vm15, %v1873_v38, %v1877_v61  ;;  %v1928_v60 = vpop.xlane.xlu0 %1927 }
 0x498   : > { %v1921_v10 = vsel %vm1919_vm14, %v1879_v8, -1e+30  ;;  %v2421_v6 = vld [vmem:[#allocation2 + $0x8] sm:$0xff] }
 0x499   : > { %v1878_v13 = vmul.f32 0.2, %v1874_v4  ;;  %v1929_v15 = vsel %vm1106_vm2, %v1921_v10, -inf  ;;  %vm1876_vm6 = vcmp.gt.f32.partialorder %v1874_v4, 0.0 }
 0x49a   : > { %1930 = vmax.xlane.f32.xlu1 %v1929_v15 }
 0x49b   : > { %v1880_v51 = vsel %vm1876_vm6, %v1874_v4, %v1878_v13 }
 0x49c   : > { %v1922_v44 = vsel %vm1920_vm4, %v1880_v51, -1e+30 }
 0x49d   : > { %v1932_v19 = vsel %vm1106_vm2, %v1922_v44, -inf }
 0x49e   : > { %1933 = vmax.xlane.f32.xlu1 %v1932_v19 }
 0x527   : > { %v1931_v24 = vpop.xlane.xlu1 %1930 }
 0x528   : > { %v1935_v45 = vmax.f32 %v1925_v21, %v1931_v24 }
 0x52a   : > { %v1937_v29 = vsub.f32 %v1917_v62, %v1935_v45  ;;  %v1943_v52 = vsub.f32 %v1921_v10, %v1935_v45 }
 0x52b   : > { %v1934_v31 = vpop.xlane.xlu1 %1933 }
 0x52c   : > { %v1939_v55 = vmul.f32 1.442695, %v1937_v29  ;;  %v1945_v35 = vmul.f32 1.442695, %v1943_v52  ;;  %v1936_v42 = vmax.f32 %v1928_v60, %v1934_v31 }
 0x52e   : > { %3390 = vpow2.f32 %v1939_v55  ;;  %v1938_v43 = vsub.f32 %v1918_v26, %v1936_v42  ;;  %v1944_v48 = vsub.f32 %v1922_v44, %v1936_v42 }
 0x52f   : > { %3392 = vpow2.f32 %v1945_v35 }
 0x530   : > { %v1941_v54 = vmul.f32 1.442695, %v1938_v43  ;;  %v1947_v28 = vmul.f32 1.442695, %v1944_v48  ;;  %v2423_v48 = vld [vmem:[#allocation2 + $0x18] sm:$0xff] }
 0x532   : > { %3394 = vpow2.f32 %v1941_v54 }
 0x533   : > { %3396 = vpow2.f32 %v1947_v28 }
 0x538   : > { %v3391_v22 = vpop.eup %3390 }
 0x539   : > { %3001 = vmatprep.mubr.msk.f32.mxu0 %vm1089_vm0, %v3391_v22  ;;  %v1949_v38 = vsel %vm1089_vm0, %v3391_v22, 0.0  ;;  %v3393_v62 = vpop.eup %3392  ;;  %v2422_v22 = vld [vmem:[#allocation2 + $0x10] sm:$0xff] }
 0x53a   : > { %1950 = vadd.xlane.f32.xlu0 %v1949_v38  ;;  %v1955_v61 = vsel %vm1106_vm2, %v3393_v62, 0.0 }
 0x53c   : > { %v3395_v53 = vpop.eup %3394 }
 0x53d   : > { %3002 = vmatmul.mubr.msk.f32.vlgmr.msra.gmra.mrb[6].mxu0 %vm1089_vm0, %v3395_v53  ;;  %v1952_v26 = vsel %vm1089_vm0, %v3395_v53, 0.0  ;;  %v3397_v0 = vpop.eup %3396  ;;  %v2425_v53 = vld [vmem:[#allocation2 + $0x28] sm:$0xff] }
 0x53e   : > { %1956 = vadd.xlane.f32.xlu0 %v1955_v61  ;;  %1953 = vadd.xlane.f32.xlu1 %v1952_v26  ;;  %v1958_v2 = vsel %vm1106_vm2, %v3397_v0, 0.0 }
 0x53f   : > { %3271 = vmatpush3.bf16.msra.mxu0 %v3862_v5  ;;  %v2303_v5 = vld [vmem:[%s4408_s12 + $0x20] sm:$0xff] }
 0x540   : > { %3273 = vmatprep.subr.bf16.mxu0 %v3877_v11 }
 0x542   : > { %1959 = vadd.xlane.f32.xlu1 %v1958_v2 }
 0x543   : > { %3275 = vmatpush3.bf16.msra.mxu0 %v3877_v11  ;;  %v2304_v11 = vld [vmem:[%s4408_s12 + $0x28] sm:$0xff] }
 0x544   : > { %3277 = vmatprep.subr.bf16.mxu0 %v3894_v16 }
 0x547   : > { %3279 = vmatpush3.bf16.msra.mxu0 %v3894_v16  ;;  %v3336_v16 = vpack.c.bf16 %v2304_v11, %v2303_v5 }
 0x548   : > { %3281 = vmatprep.subr.bf16.mxu0 %v3914_v23 }
 0x549   : > { %3337 = vmatprep.subr.bf16.mxu1 %v3336_v16 }
 0x54a   : > { %3339 = vmatpush3.bf16.msra.mxu1 %v3336_v16 }
 0x54b   : > { %3283 = vmatpush3.bf16.msra.mxu0 %v3914_v23 }
 0x54c   : > { %3285 = vmatprep.subr.bf16.mxu0 %v3934_v30 }
 0x54f   : > { %3287 = vmatpush3.bf16.msra.mxu0 %v3934_v30 }
 0x550   : > { %3289 = vmatprep.subr.bf16.mxu0 %v3954_v41 }
 0x553   : > { %3291 = vmatpush3.bf16.msra.mxu0 %v3954_v41 }
 0x554   : > { %3293 = vmatprep.subr.bf16.mxu0 %v3971_v47 }
 0x557   : > { %3295 = vmatpush3.bf16.msra.mxu0 %v3971_v47 }
 0x558   : > { %3297 = vmatprep.subr.bf16.mxu0 %v4015_v7 }
 0x55b   : > { %3299 = vmatpush3.bf16.msra.mxu0 %v4015_v7 }
 0x55c   : > { %2746 = vmatprep.subr.msk.mxu0 %vm1335_vm5, %v3817_v9  ;;  %v2305_v9 = vld [vmem:[%s4408_s12 + $0x30] sm:$0xff] }
 0x610   : > { %v3003_v23 = vpop.f32.mrb[6].mxu0 }
 0x611   : > { %v2033_v30 = vpop.f32.mrb[7].mxu0  ;;  %v2043_v47 = vmul.f32 %v3003_v23, %v2772_v32 }
 0x612   : > { %v2042_v41 = vmul.f32 %v2771_v33, %v2033_v30 }
 0x614   : > { %3036 = vmatprep.mubr.f32.mxu0 %v2042_v41 }
 0x615   : > { %3037 = vmatmul.mubr.f32.vlgmr.msra.gmra.mrb[8].mxu0 %v2043_v47 }
 0x616   : > { %2747 = vmatpush1.msk.msra.mxu0 %vm1335_vm5, %v3826_v49  ;;  %2189 = vmatprep.mubr.f32.mxu0 %v3435_v59  ;;  %v2306_v49 = vld [vmem:[%s4408_s12 + $0x38] sm:$0xff] }
 0x617   : > { %3300 = vmatprep.subr.bf16.mxu0 %v3434_v17 }
 0x619   : > { %2748 = vmatmul.mubr.msk.f32.vlgmr.msra.gmra.mrb[10].mxu0 %vm1106_vm2, %v3393_v62 }
 0x61a   : > { %2195 = vmatprep.mubr.f32.mxu0 %v3435_v59  ;;  %3302 = vmatpush1.bf16.msra.mxu0 %v3848_v1  ;;  %v3340_v59 = vpack.c.bf16 %v2306_v49, %v2305_v9  ;;  %v1951_v1 = vpop.xlane.xlu0 %1950 }
 0x61b   : > { %3303 = vmatprep.subr.bf16.mxu0 %v3434_v17  ;;  %3398 = vrcp.f32 %v1951_v1 }
 0x61c   : > { %3341 = vmatprep.subr.bf16.mxu1 %v3340_v59 }
 0x61d   : > { %2749 = vmatmul.mubr.msk.f32.gmra.mrb[12].mxu0 %vm1106_vm2, %v3397_v0  ;;  %3343 = vmatpush3.bf16.msra.mxu1 %v3340_v59  ;;  %v2424_v0 = vld [vmem:[#allocation2 + $0x20] sm:$0xff] }
 0x61e   : > { %3305 = vmatpush1.bf16.msra.mxu0 %v3860_v57  ;;  %v1954_v57 = vpop.xlane.xlu1 %1953  ;;  %v1957_v33 = vpop.xlane.xlu0 %1956 }
 0x61f   : > { %3306 = vmatprep.subr.bf16.mxu0 %v3434_v17  ;;  %3400 = vrcp.f32 %v1954_v57  ;;  %v2297_v4 = vadd.f32 %v1957_v33, %v1951_v1 }
 0x620   : > { %3402 = vrcp.f32 %v1957_v33 }
 0x621   : > { %3404 = vrcp.f32 %v2297_v4 }
 0x622   : > { %3308 = vmatpush1.bf16.msra.mxu0 %v3888_v14 }
 0x623   : > { %3309 = vmatprep.subr.bf16.mxu0 %v3434_v17 }
 0x626   : > { %3311 = vmatpush1.bf16.msra.mxu0 %v3908_v20  ;;  %v3399_v20 = vpop.eup %3398 }
 0x627   : > { %3312 = vmatprep.subr.bf16.mxu0 %v3434_v17 }
 0x62a   : > { %3314 = vmatpush1.bf16.msra.mxu0 %v3928_v27  ;;  %v3401_v27 = vpop.eup %3400 }
 0x62b   : > { %3315 = vmatprep.subr.bf16.mxu0 %v3434_v17  ;;  %v3403_v36 = vpop.eup %3402 }
 0x62c   : > { %v3405_v19 = vpop.eup %3404 }
 0x62e   : > { %3317 = vmatpush1.bf16.msra.mxu0 %v3948_v34 }
 0x62f   : > { %3318 = vmatprep.subr.bf16.mxu0 %v3434_v17 }
 0x632   : > { %3320 = vmatpush1.bf16.msra.mxu0 %v3968_v46 }
 0x633   : > { %3321 = vmatprep.subr.bf16.mxu0 %v3434_v17 }
 0x636   : > { %3323 = vmatpush1.bf16.msra.mxu0 %v3982_v58 }
 0x637   : > { %3324 = vmatprep.subr.bf16.mxu0 %v3434_v17 }
 0x63a   : > { %3326 = vmatpush1.bf16.msra.mxu0 %v3994_v63 }
 0x63b   : > { %3327 = vmatprep.subr.bf16.mxu0 %v3434_v17 }
 0x63e   : > { %3329 = vmatpush1.bf16.msra.mxu0 %v4004_v3 }
 0x63f   : > { %3330 = vmatprep.subr.bf16.mxu0 %v3434_v17 }
 0x642   : > { %3332 = vmatpush1.bf16.msra.mxu0 %v4023_v12 }
 0x643   : > { %3333 = vmatprep.subr.bf16.mxu0 %v3434_v17 }
 0x646   : > { %3335 = vmatpush1.bf16.msra.mxu0 %v4035_v18 }
 0x6e8   : > { %v3038_v14 = vpop.f32.mrb[8].mxu0 }
 0x6e9   : > { %v2110_v17 = vpop.f32.mrb[9].mxu0  ;;  %v2290_v46 = vmul.f32 %v3401_v27, %v3038_v14 }
 0x6ea   : > { %v2289_v34 = vmul.f32 %v3399_v20, %v2110_v17 }
 0x6ec   : > { %v2191_v58 = vpop.f32.mrb[10].mxu0  ;;  %3047 = vmatprep.mubr.msk.f32.mxu1 %vm857_vm3, %v2289_v34 }
 0x6ed   : > { %v2193_v63 = vpop.f32.mrb[11].mxu0  ;;  %3048 = vmatmul.mubr.msk.f32.vlgmr.msra.gmra.mrb[24].mxu1 %vm857_vm3, %v2290_v46  ;;  %v2202_v7 = vmul.f32 %v2191_v58, %v1663_v37 }
 0x6ee   : > { %v2203_v3 = vmul.f32 %v2193_v63, %v1664_v50  ;;  %v1960_v50 = vpop.xlane.xlu1 %1959 }
 0x6ef   : > { %v2298_v56 = vadd.f32 %v1960_v50, %v1954_v57  ;;  %3406 = vrcp.f32 %v1960_v50 }
 0x6f0   : > { %v2197_v12 = vpop.f32.mrb[12].mxu0  ;;  %2750 = vmatprep.mubr.msk.f32.mxu0 %vm997_vm1, %v2203_v3 }
 0x6f1   : > { %v2199_v18 = vpop.f32.mrb[13].mxu0  ;;  %2277 = vmatmul.mubr.f32.vlgmr.msra.gmra.mrb[14].mxu0 %v2202_v7  ;;  %v2204_v32 = vmul.f32 %v2197_v12, %v1665_v40  ;;  %3408 = vrcp.f32 %v2298_v56 }
 0x6f2   : > { %v2205_v25 = vmul.f32 %v2199_v18, %v1666_v39  ;;  %v2420_v39 = vld [vmem:[#allocation2] sm:$0xff] }
 0x6f4   : > { %2751 = vmatprep.mubr.msk.f32.mxu0 %vm997_vm1, %v2205_v25 }
 0x6f5   : > { %2282 = vmatmul.mubr.f32.gmra.mrb[16].mxu0 %v2204_v32 }
 0x6f9   : > { %v3407_v24 = vpop.eup %3406 }
 0x6fb   : > { %v3409_v31 = vpop.eup %3408 }
 0x7c0   : > { %v3049_v37 = vpop.f32.mrb[24].mxu1 }
 0x7c1   : > { %v2427_v8 = vadd.f32 %v3049_v37, %v2421_v6  ;;  %v2391_v10 = vpop.f32.mrb[25].mxu1 }
 0x7c2   : > { %v2426_v13 = vadd.f32 %v2420_v39, %v2391_v10 }
 0x7c3   : > { %2433 = vst.msk [vmem:[#allocation2 + $0x8] sm:$0xff] %vm857_vm3, %v2427_v8 }
 0x7c4   : > { %2432 = vst.msk [vmem:[#allocation2] sm:$0xff] %vm857_vm3, %v2426_v13  ;;  %v2278_v40 = vpop.f32.mrb[14].mxu0 }
 0x7c5   : > { %v2293_v15 = vmul.f32 %v3403_v36, %v2278_v40  ;;  %v2295_v51 = vadd.f32 %v2278_v40, %v2110_v17  ;;  %v2280_v44 = vpop.f32.mrb[15].mxu0 }
 0x7c7   : > { %v2301_v21 = vmul.f32 %v3405_v19, %v2295_v51  ;;  %3050 = vmatprep.mubr.msk.f32.mxu1 %vm857_vm3, %v2293_v15 }
 0x7c8   : > { %v2283_v45 = vpop.f32.mrb[16].mxu0 }
 0x7c9   : > { %v2294_v29 = vmul.f32 %v3407_v24, %v2283_v45  ;;  %v2296_v52 = vadd.f32 %v3038_v14, %v2283_v45  ;;  %v2285_v60 = vpop.f32.mrb[17].mxu0 }
 0x7ca   : > { %v2439_v55 = vld [vmem:[#allocation2 + $0x8] sm:$0xff] }
 0x7cb   : > { %2445 = vst.msk [vmem:[%s791_s15 + $0x8] sm:$0xff] %vm857_vm3, %v2439_v55  ;;  %v2438_v35 = vld [vmem:[#allocation2] sm:$0xff]  ;;  %v2302_v42 = vmul.f32 %v3409_v31, %v2296_v52  ;;  %3051 = vmatmul.mubr.msk.f32.gmra.mrb[26].mxu1 %vm857_vm3, %v2294_v29 }
 0x7cc   : > { %2444 = vst.msk [vmem:[%s791_s15] sm:$0xff] %vm857_vm3, %v2438_v35  ;;  %3053 = vmatprep.mubr.msk.f32.mxu1 %vm857_vm3, %v2301_v21 }
 0x7cf   : > { %3054 = vmatmul.mubr.msk.f32.gmra.mrb[28].mxu1 %vm857_vm3, %v2302_v42 }
 0x89e   : > { %v3052_v43 = vpop.f32.mrb[26].mxu1 }
 0x89f   : > { %v2429_v54 = vadd.f32 %v3052_v43, %v2423_v48  ;;  %v2401_v28 = vpop.f32.mrb[27].mxu1 }
 0x8a0   : > { %v2428_v38 = vadd.f32 %v2422_v22, %v2401_v28 }
 0x8a1   : > { %2435 = vst.msk [vmem:[#allocation2 + $0x18] sm:$0xff] %vm857_vm3, %v2429_v54 }
 0x8a2   : > { %2434 = vst.msk [vmem:[#allocation2 + $0x10] sm:$0xff] %vm857_vm3, %v2428_v38  ;;  %v3055_v62 = vpop.f32.mrb[28].mxu1 }
 0x8a3   : > { %v2431_v61 = vadd.f32 %v3055_v62, %v2425_v53  ;;  %v2411_v26 = vpop.f32.mrb[29].mxu1 }
 0x8a4   : > { %v2430_v2 = vadd.f32 %v2424_v0, %v2411_v26 }
 0x8a5   : > { %2437 = vst.msk [vmem:[#allocation2 + $0x28] sm:$0xff] %vm857_vm3, %v2431_v61 }
 0x8a6   : > { %2436 = vst.msk [vmem:[#allocation2 + $0x20] sm:$0xff] %vm857_vm3, %v2430_v2 }
 0x8a8   : > { %v2441_v5 = vld [vmem:[#allocation2 + $0x18] sm:$0xff] }
 0x8a9   : > { %2447 = vst.msk [vmem:[%s797_s27 + $0x8] sm:$0xff] %vm857_vm3, %v2441_v5  ;;  %v2440_v11 = vld [vmem:[#allocation2 + $0x10] sm:$0xff] }
 0x8aa   : > { %2446 = vst.msk [vmem:[%s797_s27] sm:$0xff] %vm857_vm3, %v2440_v11 }
 0x8ac   : > { %v2443_v16 = vld [vmem:[#allocation2 + $0x28] sm:$0xff] }
 0x8ad   : > { %2449 = vst.msk [vmem:[%s803_s26 + $0x8] sm:$0xff] %vm857_vm3, %v2443_v16  ;;  %v2442_v23 = vld [vmem:[#allocation2 + $0x20] sm:$0xff] }
 0x8ae   : > { %2448 = vst.msk [vmem:[%s803_s26] sm:$0xff] %vm857_vm3, %v2442_v23 }
 0x8af PF: > { %s4422_s20 = sld [smem:[#allocation7_spill]]  ;;  %s4423_s22 = sld [smem:[#allocation8_spill]] }
 0x8b0   : > { %s4424_s18 = smov %s3428_s19 }
 0x8b5   : > { %p23_p9 = scmp.ge.s32.totalorder %s4422_s20, 10   ;;  %s4425_s19 = smov %s4423_s22 }
 0x8b7   :  { %25 = sbr.rel (!%p23_p9) target bundleno = 4 (0x4), region = 319 }

</bundles_post_ra>
